<compile_context>
chip_gen: v6e
topology: v6e:2x2x1
jax: 0.10.0
libtpu: 0.0.40
codegen_flags: <defaults>
</compile_context>

<pallas_src>
import functools

import jax
import jax.numpy as jnp
from jax.experimental import pallas as pl
from jax.experimental.pallas import tpu as pltpu


# ----------------------------------------------------------------------------
# Fused kernel: grouped conv (as dense masked matmul) + bias + GroupNorm(2, C)
# ----------------------------------------------------------------------------

def _iconv_kernel(xp_ref, w_ref, b_ref, gamma_ref, beta_ref, o_ref):
    """One image per grid step.

    Block shapes:
      xp_ref:    (1, Hp, Wp, Cin)   spatially pre-padded input, NHWC
      w_ref:     (k, k, Cin, Cout)  dense (block-diagonal masked) conv weight
      b_ref:     (1, Cout)          conv bias (zeros when bias=False)
      gamma_ref: (1, Cout)          GroupNorm scale
      beta_ref:  (1, Cout)          GroupNorm shift
      o_ref:     (1, HW, Cout)
    """
    _, hp, wp, cin = xp_ref.shape
    k = w_ref.shape[0]
    cout = w_ref.shape[-1]
    h, wd = hp - (k - 1), wp - (k - 1)
    hw = h * wd

    xp = xp_ref[0]                      # (Hp, Wp, Cin)
    wts = w_ref[...]                    # (k, k, Cin, Cout)

    # ---- convolution: accumulate k*k per-tap matmuls in f32 -----------------
    acc = jnp.zeros((hw, cout), jnp.float32)
    for dy in range(k):
        for dx in range(k):
            patch = xp[dy:dy + h, dx:dx + wd, :].reshape(hw, cin)
            acc = acc + jnp.dot(patch, wts[dy, dx],
                                preferred_element_type=jnp.float32)
    acc = acc + b_ref[...]              # (1, Cout) broadcasts over rows

    # ---- GroupNorm(2, Cout): column sums first, cheap (1, C) group split ----
    col_s = jnp.sum(acc, axis=0, keepdims=True)        # (1, Cout)  sum x
    col_q = jnp.sum(acc * acc, axis=0, keepdims=True)  # (1, Cout)  sum x^2

    cg = cout // 2
    cnt = float(cg * hw)
    lane_c = jax.lax.broadcasted_iota(jnp.int32, (1, cout), 1)
    is_g0 = lane_c < cg

    s0 = jnp.sum(jnp.where(is_g0, col_s, 0.0), axis=1, keepdims=True)  # (1,1)
    q0 = jnp.sum(jnp.where(is_g0, col_q, 0.0), axis=1, keepdims=True)
    s_all = jnp.sum(col_s, axis=1, keepdims=True)
    q_all = jnp.sum(col_q, axis=1, keepdims=True)
    s1, q1 = s_all - s0, q_all - q0

    m0, m1 = s0 / cnt, s1 / cnt
    v0 = q0 / cnt - m0 * m0
    v1 = q1 / cnt - m1 * m1
    inv0 = jax.lax.rsqrt(v0 + 1e-5)     # eps matches torch.nn.GroupNorm default
    inv1 = jax.lax.rsqrt(v1 + 1e-5)

    mean_c = jnp.where(is_g0, m0, m1)   # (1, Cout)
    inv_c = jnp.where(is_g0, inv0, inv1)

    scale = inv_c * gamma_ref[...]      # fold GN affine into one FMA epilogue
    shift = beta_ref[...] - mean_c * scale
    o_ref[0] = acc * scale + shift


# ----------------------------------------------------------------------------
# Parameter helpers (PyTorch grouped-conv layout -> dense masked weight)
# ----------------------------------------------------------------------------

def _dense_weight(w_grouped, cin, cout, groups, kernel):
    """(Cout, Cin//groups, k, k) grouped weight -> dense (k, k, Cin, Cout)."""
    cin_g, cout_g = cin // groups, cout // groups
    dense = jnp.zeros((kernel, kernel, cin, cout), jnp.float32)
    for g in range(groups):
        blk = w_grouped[g * cout_g:(g + 1) * cout_g]      # (cout_g, cin_g, k, k)
        blk = jnp.transpose(blk, (2, 3, 1, 0))            # (k, k, cin_g, cout_g)
        dense = dense.at[:, :, g * cin_g:(g + 1) * cin_g,
                         g * cout_g:(g + 1) * cout_g].set(blk)
    return dense


def init_params(key, ch_in, ch_out, kernel, groups, bias=False):
    kw, kb, kg, kbt = jax.random.split(key, 4)
    cin_g = ch_in // groups
    bound = 1.0 / float((cin_g * kernel * kernel) ** 0.5)
    p = {
        'w': jax.random.uniform(kw, (ch_out, cin_g, kernel, kernel),
                                jnp.float32, -bound, bound),
        'gamma': 1.0 + 0.05 * jax.random.normal(kg, (ch_out,), jnp.float32),
        'beta': 0.05 * jax.random.normal(kbt, (ch_out,), jnp.float32),
        'bias': (jax.random.uniform(kb, (ch_out,), jnp.float32, -bound, bound)
                 if bias else None),
    }
    return p


# ----------------------------------------------------------------------------
# Forward
# ----------------------------------------------------------------------------

def iconv_forward(x_nchw, params, *, groups, kernel,
                  matmul_dtype=jnp.float32):
    n, cin, h, wd = x_nchw.shape
    cout = params['gamma'].shape[0]
    assert kernel % 2 == 1, "only odd kernels ('same' pad is symmetric)"
    assert cin % groups == 0 and cout % groups == 0
    assert cout % 2 == 0, "GroupNorm(2, ch_out) requires even ch_out"

    w_dense = _dense_weight(params['w'], cin, cout, groups, kernel)
    bias = params.get('bias')
    if bias is None:
        bias = jnp.zeros((cout,), jnp.float32)

    # Only wrapper-side data movement: layout + 'same' zero padding.
    x = jnp.transpose(x_nchw, (0, 2, 3, 1)).astype(matmul_dtype)   # NHWC
    pad = (kernel - 1) // 2
    if pad:
        x = jnp.pad(x, ((0, 0), (pad, pad), (pad, pad), (0, 0)))
    hp, wp = h + 2 * pad, wd + 2 * pad
    hw = h * wd

    out = pl.pallas_call(
        _iconv_kernel,
        out_shape=jax.ShapeDtypeStruct((n, hw, cout), jnp.float32),
        grid=(n,),
        in_specs=[
            pl.BlockSpec((1, hp, wp, cin), lambda i: (i, 0, 0, 0)),
            pl.BlockSpec((kernel, kernel, cin, cout), lambda i: (0, 0, 0, 0)),
            pl.BlockSpec((1, cout), lambda i: (0, 0)),
            pl.BlockSpec((1, cout), lambda i: (0, 0)),
            pl.BlockSpec((1, cout), lambda i: (0, 0)),
        ],
        out_specs=pl.BlockSpec((1, hw, cout), lambda i: (i, 0, 0)),
        compiler_params=pltpu.CompilerParams(
            dimension_semantics=("parallel",)),
    )(x, w_dense.astype(matmul_dtype), bias.reshape(1, cout),
      params['gamma'].reshape(1, cout), params['beta'].reshape(1, cout))

    # (N, HW, C) -> NCHW
    return jnp.transpose(out.reshape(n, h, wd, cout), (0, 3, 1, 2))


# ----------------------------------------------------------------------------
# Pure-JAX reference (independent code path: lax grouped conv + GroupNorm)
# ----------------------------------------------------------------------------

def iconv_reference(x_nchw, params, *, groups, kernel):
    pad = (kernel - 1) // 2
    y = jax.lax.conv_general_dilated(
        x_nchw, params['w'], window_strides=(1, 1),
        padding=[(pad, pad), (pad, pad)],
        dimension_numbers=('NCHW', 'OIHW', 'NCHW'),
        feature_group_count=groups,
        precision=jax.lax.Precision.HIGHEST)
    if params.get('bias') is not None:
        y = y + params['bias'][None, :, None, None]
    n, c, h, wd = y.shape
    yg = y.reshape(n, 2, c // 2, h, wd)
    mean = jnp.mean(yg, axis=(2, 3, 4), keepdims=True)
    var = jnp.mean(jnp.square(yg - mean), axis=(2, 3, 4), keepdims=True)
    yn = ((yg - mean) / jnp.sqrt(var + 1e-5)).reshape(n, c, h, wd)
    return (yn * params['gamma'][None, :, None, None]
            + params['beta'][None, :, None, None])


# ----------------------------------------------------------------------------

if __name__ == "__main__":
    key = jax.random.PRNGKey(0)
    n, h, wd = 2, 16, 16
    ch_in = 32

    kx, kp3, kp1 = jax.random.split(key, 3)
    x = jax.random.normal(kx, (n, ch_in, h, wd), jnp.float32)   # NCHW

    # --- 3x3 grouped iConv (c2-style usage), bias=False (module default) ----
    ch_out, kernel, groups = 32, 3, 8
    params3 = init_params(kp3, ch_in, ch_out, kernel, groups, bias=False)
    fwd3 = jax.jit(functools.partial(iconv_forward, groups=groups, kernel=kernel))
    y3 = jax.block_until_ready(fwd3(x, params3))
    assert y3.shape == (n, ch_out, h, wd), y3.shape
    y3_ref = jax.block_until_ready(
        iconv_reference(x, params3, groups=groups, kernel=kernel))
    assert jnp.allclose(y3, y3_ref, atol=5e-3, rtol=5e-3), \
        float(jnp.max(jnp.abs(y3 - y3_ref)))

    # --- 1x1 grouped iConv (squeeze/c1-style usage), with bias --------------
    ch_out1, kernel1, groups1 = 32, 1, 16
    params1 = init_params(kp1, ch_in, ch_out1, kernel1, groups1, bias=True)
    fwd1 = jax.jit(functools.partial(iconv_forward, groups=groups1, kernel=kernel1))
    y1 = jax.block_until_ready(fwd1(x, params1))
    assert y1.shape == (n, ch_out1, h, wd), y1.shape
    y1_ref = jax.block_until_ready(
        iconv_reference(x, params1, groups=groups1, kernel=kernel1))
    assert jnp.allclose(y1, y1_ref, atol=5e-3, rtol=5e-3), \
        float(jnp.max(jnp.abs(y1 - y1_ref)))

    print("KERNEL_OK")
</pallas_src>

<mosaic_0001>
module attributes {stable_mosaic.version = 11 : i64} {
  func.func @_iconv_kernel(%arg0: i32, %arg1: memref<1x18x18x32xf32, #tpu.memory_space<vmem>>, %arg2: memref<3x3x32x32xf32, #tpu.memory_space<vmem>>, %arg3: memref<1x32xf32, #tpu.memory_space<vmem>>, %arg4: memref<1x32xf32, #tpu.memory_space<vmem>>, %arg5: memref<1x32xf32, #tpu.memory_space<vmem>>, %arg6: memref<1x256x32xf32, #tpu.memory_space<vmem>>) attributes {dimension_semantics = [#tpu.dimension_semantics<parallel>], iteration_bounds = array<i64: 2>, scalar_prefetch = 0 : i64, scratch_operands = 0 : i64, tpu.core_type = #tpu.core_type<tc>, window_params = [{transform_indices = @transform_0, window_bounds = array<i64: 1, 18, 18, 32>}, {pipeline_mode = #tpu.pipeline_mode<synchronous>, transform_indices = @transform_1, window_bounds = array<i64: 3, 3, 32, 32>}, {pipeline_mode = #tpu.pipeline_mode<synchronous>, transform_indices = @transform_2, window_bounds = array<i64: 1, 32>}, {pipeline_mode = #tpu.pipeline_mode<synchronous>, transform_indices = @transform_3, window_bounds = array<i64: 1, 32>}, {pipeline_mode = #tpu.pipeline_mode<synchronous>, transform_indices = @transform_4, window_bounds = array<i64: 1, 32>}, {transform_indices = @transform_5, window_bounds = array<i64: 1, 256, 32>}]} {
    %c0 = arith.constant 0 : index
    %c0_0 = arith.constant 0 : index
    %c0_1 = arith.constant 0 : index
    %c0_2 = arith.constant 0 : index
    %0 = vector.load %arg1[%c0, %c0_0, %c0_1, %c0_2] : memref<1x18x18x32xf32, #tpu.memory_space<vmem>>, vector<1x18x18x32xf32>
    %1 = vector.shape_cast %0 : vector<1x18x18x32xf32> to vector<18x18x32xf32>
    %c0_3 = arith.constant 0 : index
    %c0_4 = arith.constant 0 : index
    %c0_5 = arith.constant 0 : index
    %c0_6 = arith.constant 0 : index
    %2 = vector.load %arg2[%c0_3, %c0_4, %c0_5, %c0_6] : memref<3x3x32x32xf32, #tpu.memory_space<vmem>>, vector<3x3x32x32xf32>
    %cst = arith.constant 0.000000e+00 : f32
    %3 = vector.broadcast %cst : f32 to vector<256x32xf32>
    %4 = vector.extract_strided_slice %1 {offsets = [0, 0, 0], sizes = [16, 16, 32], strides = [1, 1, 1]} : vector<18x18x32xf32> to vector<16x16x32xf32>
    %5 = vector.shape_cast %4 : vector<16x16x32xf32> to vector<256x32xf32>
    %6 = vector.extract_strided_slice %2 {offsets = [0, 0, 0, 0], sizes = [1, 1, 32, 32], strides = [1, 1, 1, 1]} : vector<3x3x32x32xf32> to vector<1x1x32x32xf32>
    %7 = vector.shape_cast %6 : vector<1x1x32x32xf32> to vector<32x32xf32>
    %cst_7 = arith.constant dense<0.000000e+00> : vector<256x32xf32>
    %8 = tpu.matmul %5, %7, %cst_7 {dimension_numbers = #tpu.dot_dimension_numbers<[1], [0], [0], [1], [0, 0, 1, 1], [], []>} : vector<256x32xf32>, vector<32x32xf32>, vector<256x32xf32> -> vector<256x32xf32>
    %9 = arith.addf %3, %8 : vector<256x32xf32>
    %10 = vector.extract_strided_slice %1 {offsets = [0, 1, 0], sizes = [16, 16, 32], strides = [1, 1, 1]} : vector<18x18x32xf32> to vector<16x16x32xf32>
    %11 = vector.shape_cast %10 : vector<16x16x32xf32> to vector<256x32xf32>
    %12 = vector.extract_strided_slice %2 {offsets = [0, 1, 0, 0], sizes = [1, 1, 32, 32], strides = [1, 1, 1, 1]} : vector<3x3x32x32xf32> to vector<1x1x32x32xf32>
    %13 = vector.shape_cast %12 : vector<1x1x32x32xf32> to vector<32x32xf32>
    %cst_8 = arith.constant dense<0.000000e+00> : vector<256x32xf32>
    %14 = tpu.matmul %11, %13, %cst_8 {dimension_numbers = #tpu.dot_dimension_numbers<[1], [0], [0], [1], [0, 0, 1, 1], [], []>} : vector<256x32xf32>, vector<32x32xf32>, vector<256x32xf32> -> vector<256x32xf32>
    %15 = arith.addf %9, %14 : vector<256x32xf32>
    %16 = vector.extract_strided_slice %1 {offsets = [0, 2, 0], sizes = [16, 16, 32], strides = [1, 1, 1]} : vector<18x18x32xf32> to vector<16x16x32xf32>
    %17 = vector.shape_cast %16 : vector<16x16x32xf32> to vector<256x32xf32>
    %18 = vector.extract_strided_slice %2 {offsets = [0, 2, 0, 0], sizes = [1, 1, 32, 32], strides = [1, 1, 1, 1]} : vector<3x3x32x32xf32> to vector<1x1x32x32xf32>
    %19 = vector.shape_cast %18 : vector<1x1x32x32xf32> to vector<32x32xf32>
    %cst_9 = arith.constant dense<0.000000e+00> : vector<256x32xf32>
    %20 = tpu.matmul %17, %19, %cst_9 {dimension_numbers = #tpu.dot_dimension_numbers<[1], [0], [0], [1], [0, 0, 1, 1], [], []>} : vector<256x32xf32>, vector<32x32xf32>, vector<256x32xf32> -> vector<256x32xf32>
    %21 = arith.addf %15, %20 : vector<256x32xf32>
    %22 = vector.extract_strided_slice %1 {offsets = [1, 0, 0], sizes = [16, 16, 32], strides = [1, 1, 1]} : vector<18x18x32xf32> to vector<16x16x32xf32>
    %23 = vector.shape_cast %22 : vector<16x16x32xf32> to vector<256x32xf32>
    %24 = vector.extract_strided_slice %2 {offsets = [1, 0, 0, 0], sizes = [1, 1, 32, 32], strides = [1, 1, 1, 1]} : vector<3x3x32x32xf32> to vector<1x1x32x32xf32>
    %25 = vector.shape_cast %24 : vector<1x1x32x32xf32> to vector<32x32xf32>
    %cst_10 = arith.constant dense<0.000000e+00> : vector<256x32xf32>
    %26 = tpu.matmul %23, %25, %cst_10 {dimension_numbers = #tpu.dot_dimension_numbers<[1], [0], [0], [1], [0, 0, 1, 1], [], []>} : vector<256x32xf32>, vector<32x32xf32>, vector<256x32xf32> -> vector<256x32xf32>
    %27 = arith.addf %21, %26 : vector<256x32xf32>
    %28 = vector.extract_strided_slice %1 {offsets = [1, 1, 0], sizes = [16, 16, 32], strides = [1, 1, 1]} : vector<18x18x32xf32> to vector<16x16x32xf32>
    %29 = vector.shape_cast %28 : vector<16x16x32xf32> to vector<256x32xf32>
    %30 = vector.extract_strided_slice %2 {offsets = [1, 1, 0, 0], sizes = [1, 1, 32, 32], strides = [1, 1, 1, 1]} : vector<3x3x32x32xf32> to vector<1x1x32x32xf32>
    %31 = vector.shape_cast %30 : vector<1x1x32x32xf32> to vector<32x32xf32>
    %cst_11 = arith.constant dense<0.000000e+00> : vector<256x32xf32>
    %32 = tpu.matmul %29, %31, %cst_11 {dimension_numbers = #tpu.dot_dimension_numbers<[1], [0], [0], [1], [0, 0, 1, 1], [], []>} : vector<256x32xf32>, vector<32x32xf32>, vector<256x32xf32> -> vector<256x32xf32>
    %33 = arith.addf %27, %32 : vector<256x32xf32>
    %34 = vector.extract_strided_slice %1 {offsets = [1, 2, 0], sizes = [16, 16, 32], strides = [1, 1, 1]} : vector<18x18x32xf32> to vector<16x16x32xf32>
    %35 = vector.shape_cast %34 : vector<16x16x32xf32> to vector<256x32xf32>
    %36 = vector.extract_strided_slice %2 {offsets = [1, 2, 0, 0], sizes = [1, 1, 32, 32], strides = [1, 1, 1, 1]} : vector<3x3x32x32xf32> to vector<1x1x32x32xf32>
    %37 = vector.shape_cast %36 : vector<1x1x32x32xf32> to vector<32x32xf32>
    %cst_12 = arith.constant dense<0.000000e+00> : vector<256x32xf32>
    %38 = tpu.matmul %35, %37, %cst_12 {dimension_numbers = #tpu.dot_dimension_numbers<[1], [0], [0], [1], [0, 0, 1, 1], [], []>} : vector<256x32xf32>, vector<32x32xf32>, vector<256x32xf32> -> vector<256x32xf32>
    %39 = arith.addf %33, %38 : vector<256x32xf32>
    %40 = vector.extract_strided_slice %1 {offsets = [2, 0, 0], sizes = [16, 16, 32], strides = [1, 1, 1]} : vector<18x18x32xf32> to vector<16x16x32xf32>
    %41 = vector.shape_cast %40 : vector<16x16x32xf32> to vector<256x32xf32>
    %42 = vector.extract_strided_slice %2 {offsets = [2, 0, 0, 0], sizes = [1, 1, 32, 32], strides = [1, 1, 1, 1]} : vector<3x3x32x32xf32> to vector<1x1x32x32xf32>
    %43 = vector.shape_cast %42 : vector<1x1x32x32xf32> to vector<32x32xf32>
    %cst_13 = arith.constant dense<0.000000e+00> : vector<256x32xf32>
    %44 = tpu.matmul %41, %43, %cst_13 {dimension_numbers = #tpu.dot_dimension_numbers<[1], [0], [0], [1], [0, 0, 1, 1], [], []>} : vector<256x32xf32>, vector<32x32xf32>, vector<256x32xf32> -> vector<256x32xf32>
    %45 = arith.addf %39, %44 : vector<256x32xf32>
    %46 = vector.extract_strided_slice %1 {offsets = [2, 1, 0], sizes = [16, 16, 32], strides = [1, 1, 1]} : vector<18x18x32xf32> to vector<16x16x32xf32>
    %47 = vector.shape_cast %46 : vector<16x16x32xf32> to vector<256x32xf32>
    %48 = vector.extract_strided_slice %2 {offsets = [2, 1, 0, 0], sizes = [1, 1, 32, 32], strides = [1, 1, 1, 1]} : vector<3x3x32x32xf32> to vector<1x1x32x32xf32>
    %49 = vector.shape_cast %48 : vector<1x1x32x32xf32> to vector<32x32xf32>
    %cst_14 = arith.constant dense<0.000000e+00> : vector<256x32xf32>
    %50 = tpu.matmul %47, %49, %cst_14 {dimension_numbers = #tpu.dot_dimension_numbers<[1], [0], [0], [1], [0, 0, 1, 1], [], []>} : vector<256x32xf32>, vector<32x32xf32>, vector<256x32xf32> -> vector<256x32xf32>
    %51 = arith.addf %45, %50 : vector<256x32xf32>
    %52 = vector.extract_strided_slice %1 {offsets = [2, 2, 0], sizes = [16, 16, 32], strides = [1, 1, 1]} : vector<18x18x32xf32> to vector<16x16x32xf32>
    %53 = vector.shape_cast %52 : vector<16x16x32xf32> to vector<256x32xf32>
    %54 = vector.extract_strided_slice %2 {offsets = [2, 2, 0, 0], sizes = [1, 1, 32, 32], strides = [1, 1, 1, 1]} : vector<3x3x32x32xf32> to vector<1x1x32x32xf32>
    %55 = vector.shape_cast %54 : vector<1x1x32x32xf32> to vector<32x32xf32>
    %cst_15 = arith.constant dense<0.000000e+00> : vector<256x32xf32>
    %56 = tpu.matmul %53, %55, %cst_15 {dimension_numbers = #tpu.dot_dimension_numbers<[1], [0], [0], [1], [0, 0, 1, 1], [], []>} : vector<256x32xf32>, vector<32x32xf32>, vector<256x32xf32> -> vector<256x32xf32>
    %57 = arith.addf %51, %56 : vector<256x32xf32>
    %c0_16 = arith.constant 0 : index
    %c0_17 = arith.constant 0 : index
    %58 = vector.load %arg3[%c0_16, %c0_17] : memref<1x32xf32, #tpu.memory_space<vmem>>, vector<1x32xf32>
    %59 = vector.broadcast %58 : vector<1x32xf32> to vector<256x32xf32>
    %60 = arith.addf %57, %59 : vector<256x32xf32>
    %cst_18 = arith.constant dense<0.000000e+00> : vector<32xf32>
    %61 = vector.multi_reduction <add>, %60, %cst_18 [0] : vector<256x32xf32> to vector<32xf32>
    %62 = vector.shape_cast %61 : vector<32xf32> to vector<1x32xf32>
    %63 = arith.mulf %60, %60 : vector<256x32xf32>
    %cst_19 = arith.constant dense<0.000000e+00> : vector<32xf32>
    %64 = vector.multi_reduction <add>, %63, %cst_19 [0] : vector<256x32xf32> to vector<32xf32>
    %65 = vector.shape_cast %64 : vector<32xf32> to vector<1x32xf32>
    %66 = tpu.iota {dimensions = array<i32: 1>} : vector<1x32xi32>
    %c16_i32 = arith.constant 16 : i32
    %67 = vector.broadcast %c16_i32 : i32 to vector<1x32xi32>
    %68 = arith.cmpi slt, %66, %67 : vector<1x32xi32>
    %cst_20 = arith.constant 0.000000e+00 : f32
    %69 = vector.broadcast %cst_20 : f32 to vector<1x32xf32>
    %70 = arith.select %68, %62, %69 : vector<1x32xi1>, vector<1x32xf32>
    %cst_21 = arith.constant dense<0.000000e+00> : vector<1xf32>
    %71 = vector.multi_reduction <add>, %70, %cst_21 [1] : vector<1x32xf32> to vector<1xf32>
    %72 = vector.shape_cast %71 : vector<1xf32> to vector<1x1xf32>
    %cst_22 = arith.constant 0.000000e+00 : f32
    %73 = vector.broadcast %cst_22 : f32 to vector<1x32xf32>
    %74 = arith.select %68, %65, %73 : vector<1x32xi1>, vector<1x32xf32>
    %cst_23 = arith.constant dense<0.000000e+00> : vector<1xf32>
    %75 = vector.multi_reduction <add>, %74, %cst_23 [1] : vector<1x32xf32> to vector<1xf32>
    %76 = vector.shape_cast %75 : vector<1xf32> to vector<1x1xf32>
    %cst_24 = arith.constant dense<0.000000e+00> : vector<1xf32>
    %77 = vector.multi_reduction <add>, %62, %cst_24 [1] : vector<1x32xf32> to vector<1xf32>
    %78 = vector.shape_cast %77 : vector<1xf32> to vector<1x1xf32>
    %cst_25 = arith.constant dense<0.000000e+00> : vector<1xf32>
    %79 = vector.multi_reduction <add>, %65, %cst_25 [1] : vector<1x32xf32> to vector<1xf32>
    %80 = vector.shape_cast %79 : vector<1xf32> to vector<1x1xf32>
    %81 = arith.subf %78, %72 : vector<1x1xf32>
    %82 = arith.subf %80, %76 : vector<1x1xf32>
    %cst_26 = arith.constant 4.096000e+03 : f32
    %83 = vector.broadcast %cst_26 : f32 to vector<1x1xf32>
    %84 = arith.divf %72, %83 : vector<1x1xf32>
    %cst_27 = arith.constant 4.096000e+03 : f32
    %85 = vector.broadcast %cst_27 : f32 to vector<1x1xf32>
    %86 = arith.divf %81, %85 : vector<1x1xf32>
    %cst_28 = arith.constant 4.096000e+03 : f32
    %87 = vector.broadcast %cst_28 : f32 to vector<1x1xf32>
    %88 = arith.divf %76, %87 : vector<1x1xf32>
    %89 = arith.mulf %84, %84 : vector<1x1xf32>
    %90 = arith.subf %88, %89 : vector<1x1xf32>
    %cst_29 = arith.constant 4.096000e+03 : f32
    %91 = vector.broadcast %cst_29 : f32 to vector<1x1xf32>
    %92 = arith.divf %82, %91 : vector<1x1xf32>
    %93 = arith.mulf %86, %86 : vector<1x1xf32>
    %94 = arith.subf %92, %93 : vector<1x1xf32>
    %cst_30 = arith.constant 9.99999974E-6 : f32
    %95 = vector.broadcast %cst_30 : f32 to vector<1x1xf32>
    %96 = arith.addf %90, %95 : vector<1x1xf32>
    %97 = math.rsqrt %96 : vector<1x1xf32>
    %cst_31 = arith.constant 9.99999974E-6 : f32
    %98 = vector.broadcast %cst_31 : f32 to vector<1x1xf32>
    %99 = arith.addf %94, %98 : vector<1x1xf32>
    %100 = math.rsqrt %99 : vector<1x1xf32>
    %101 = vector.shape_cast %84 : vector<1x1xf32> to vector<1x1xf32>
    %102 = vector.broadcast %101 : vector<1x1xf32> to vector<1x32xf32>
    %103 = vector.shape_cast %86 : vector<1x1xf32> to vector<1x1xf32>
    %104 = vector.broadcast %103 : vector<1x1xf32> to vector<1x32xf32>
    %105 = arith.select %68, %102, %104 : vector<1x32xi1>, vector<1x32xf32>
    %106 = vector.shape_cast %97 : vector<1x1xf32> to vector<1x1xf32>
    %107 = vector.broadcast %106 : vector<1x1xf32> to vector<1x32xf32>
    %108 = vector.shape_cast %100 : vector<1x1xf32> to vector<1x1xf32>
    %109 = vector.broadcast %108 : vector<1x1xf32> to vector<1x32xf32>
    %110 = arith.select %68, %107, %109 : vector<1x32xi1>, vector<1x32xf32>
    %c0_32 = arith.constant 0 : index
    %c0_33 = arith.constant 0 : index
    %111 = vector.load %arg4[%c0_32, %c0_33] : memref<1x32xf32, #tpu.memory_space<vmem>>, vector<1x32xf32>
    %112 = arith.mulf %110, %111 : vector<1x32xf32>
    %c0_34 = arith.constant 0 : index
    %c0_35 = arith.constant 0 : index
    %113 = vector.load %arg5[%c0_34, %c0_35] : memref<1x32xf32, #tpu.memory_space<vmem>>, vector<1x32xf32>
    %114 = arith.mulf %105, %112 : vector<1x32xf32>
    %115 = arith.subf %113, %114 : vector<1x32xf32>
    %116 = vector.broadcast %112 : vector<1x32xf32> to vector<256x32xf32>
    %117 = arith.mulf %60, %116 : vector<256x32xf32>
    %118 = vector.broadcast %115 : vector<1x32xf32> to vector<256x32xf32>
    %119 = arith.addf %117, %118 : vector<256x32xf32>
    %c0_36 = arith.constant 0 : index
    %c0_37 = arith.constant 0 : index
    %c0_38 = arith.constant 0 : index
    %120 = vector.load %arg6[%c0_36, %c0_37, %c0_38] : memref<1x256x32xf32, #tpu.memory_space<vmem>>, vector<1x256x32xf32>
    %121 = vector.shape_cast %120 : vector<1x256x32xf32> to vector<256x32xf32>
    %122 = vector.shape_cast %119 : vector<256x32xf32> to vector<1x256x32xf32>
    tpu.vector_store %arg6[%c0_36, %c0_37, %c0_38], %122 {strides = array<i32>} : memref<1x256x32xf32, #tpu.memory_space<vmem>>, vector<1x256x32xf32>,
    return
  }
  func.func @transform_0(%arg0: i32) -> (i32, i32, i32, i32) {
    %c0_i32 = arith.constant 0 : i32
    %c0_i32_0 = arith.constant 0 : i32
    %c0_i32_1 = arith.constant 0 : i32
    %c0_i32_2 = arith.constant 0 : i32
    return %arg0, %c0_i32, %c0_i32_0, %c0_i32_1 : i32, i32, i32, i32
  }
  func.func @transform_1(%arg0: i32) -> (i32, i32, i32, i32) {
    %c0_i32 = arith.constant 0 : i32
    %c0_i32_0 = arith.constant 0 : i32
    %c0_i32_1 = arith.constant 0 : i32
    %c0_i32_2 = arith.constant 0 : i32
    %c0_i32_3 = arith.constant 0 : i32
    return %c0_i32, %c0_i32_0, %c0_i32_1, %c0_i32_2 : i32, i32, i32, i32
  }
  func.func @transform_2(%arg0: i32) -> (i32, i32) {
    %c0_i32 = arith.constant 0 : i32
    %c0_i32_0 = arith.constant 0 : i32
    %c0_i32_1 = arith.constant 0 : i32
    return %c0_i32, %c0_i32_0 : i32, i32
  }
  func.func @transform_3(%arg0: i32) -> (i32, i32) {
    %c0_i32 = arith.constant 0 : i32
    %c0_i32_0 = arith.constant 0 : i32
    %c0_i32_1 = arith.constant 0 : i32
    return %c0_i32, %c0_i32_0 : i32, i32
  }
  func.func @transform_4(%arg0: i32) -> (i32, i32) {
    %c0_i32 = arith.constant 0 : i32
    %c0_i32_0 = arith.constant 0 : i32
    %c0_i32_1 = arith.constant 0 : i32
    return %c0_i32, %c0_i32_0 : i32, i32
  }
  func.func @transform_5(%arg0: i32) -> (i32, i32, i32) {
    %c0_i32 = arith.constant 0 : i32
    %c0_i32_0 = arith.constant 0 : i32
    %c0_i32_1 = arith.constant 0 : i32
    return %arg0, %c0_i32, %c0_i32_0 : i32, i32, i32
  }
}

</mosaic_0001>

<bundles_post_ra>
// kernel: iconv_forward.1
= control target key start
LH: loop header
LB: loop body
LE: loop exit
PB: predicated region body
PF: predicated region fallthrough
CT: control target
= control target key end

     0   :  { %10 = vsyncpa [#allocation3], 0  ;;  %s6852_s0 = inlined_call_operand.vmem [shape: f32[2,18,18,32], index: 0, kind: input, shape index: {}]   ;;  %s6853_s1 = inlined_call_operand.vmem [shape: f32[3,3,32,32], index: 1, kind: input, shape index: {}]   ;;  %s6854_s2 = inlined_call_operand.vmem [shape: f32[1,32], index: 2, kind: input, shape index: {}]   ;;  %s6855_s3 = inlined_call_operand.vmem [shape: f32[1,32], index: 3, kind: input, shape index: {}]   ;;  %s6856_s4 = inlined_call_operand.vmem [shape: f32[1,32], index: 4, kind: input, shape index: {}]   ;;  %s6857_s5 = inlined_call_operand.hbm [shape: f32[2,256,32], index: 5, kind: output, shape index: {}]  }
   0x1   :  { %12 = vsyncpa [#allocation3 + $0x1], 0  ;;  %s4723_s18 = smov 0   ;;  %s4725_s19 = smov 0  }
   0x2   :  { %s4727_s20 = smov 0   ;;  %s4729_s21 = smov 0  }
   0x3 LB: > { %s4744_s22 = sadd.s32 4294967295, %s4688_s21   ;;  %s3445_s23 = sadd.s32 4294967294, %s4688_s21   ;;  %s4688_s21 = sphi %s4729_s21, %s7091_s21   ;;  %s4684_s20 = sphi %s4727_s20, %s7090_s20   ;;  %s4680_s19 = sphi %s4725_s19, %s7089_s19   ;;  %s4676_s18 = sphi %s4723_s18, %s7088_s18  }
   0x4   : > { %s4748_s24 = sadd.s32 1, %s4688_s21   ;;  %s135_s25 = sadd.s32 1, %s4684_s20 }
   0x5   : > { %s132_s26 = ssub.s32 %s4688_s21, %s4748_s24  ;;  %p145_p0 = scmp.ne.s32.totalorder %s4684_s20, %s4680_s19 }
   0x6   : > { %p133_p1 = scmp.eq.s32.totalorder %s132_s26, 0  ;;  %p146_p2 = scmp.eq.s32.totalorder %s4744_s22, 1 }
   0x7   : > { %p151_p3 = scmp.ne.s32.totalorder %s4680_s19, %s4676_s18  ;;  %p152_p4 = scmp.eq.s32.totalorder %s3445_s23, 1 }
   0x8   : > { %s4759_s27 = scalar_select %p133_p1, %s4684_s20, %s135_s25  }
   0x9   : > { %p4761_p5 = por %p146_p2, %p145_p0  ;;  %p4765_p6 = por %p152_p4, %p151_p3 }
   0xa   : > { %p3448_p7 = scmp.ge.s32.totalorder %s4688_s21, 1  ;;  %p190_p8 = scmp.lt.s32.totalorder %s4688_s21, 3 }
   0xc   : > { %p191_p9 = pnand %p3448_p7, %p190_p8 }
   0xe   : > { %194 = sbr.rel (%p191_p9) target bundleno = 748 (0x2ec), region = 40 }
  0x13   : > { %v284_v0 = vld [vmem:[%s6853_s1 + $0x38] sm:$0xff]  ;;  %v283_v1 = vld [vmem:[%s6853_s1 + $0x30] sm:$0xff]  ;;  %p218_p10 = scmp.lt.s32.totalorder %s4744_s22, 1  ;;  %v282_v2 = vld [vmem:[%s6853_s1 + $0x28] sm:$0xff]  ;;  %vm361_vm0 = vcmask 1046528   ;;  %vm442_vm1 = vcmask 261120  }
  0x14   : > { %4574 = vmatprep.subr.mxu1 %v284_v0  ;;  %4070 = vmatprep.subr.mxu0 %v284_v0  ;;  %v281_v3 = vld [vmem:[%s6853_s1 + $0x20] sm:$0xff]  ;;  %v280_v4 = vld [vmem:[%s6853_s1 + $0x18] sm:$0xff]  ;;  %v279_v24 = vld [vmem:[%s6853_s1 + $0x10] sm:$0xff]  ;;  %vm1021_vm2 = vcmask 1045504   ;;  %s4690_s30 = smov [#allocation2]  }
  0x15   : > { %4578 = vmatpush3.msra.mxu1 %v284_v0  ;;  %4071 = vmatpush3.msra.mxu0 %v284_v0  ;;  %s219_s11 = scalar_select %p218_p10, %s4744_s22, 1  ;;  %v288_v5 = vld [vmem:[%s6853_s1 + $0x58] sm:$0xff]  ;;  %v287_v44 = vld [vmem:[%s6853_s1 + $0x50] sm:$0xff]  ;;  %v278_v52 = vld [vmem:[%s6853_s1 + $0x8] sm:$0xff] }
  0x16   : > { %4575 = vmatprep.subr.mxu1 %v283_v1  ;;  %4072 = vmatprep.subr.mxu0 %v283_v1 }
  0x17   : > { %4579 = vmatpush3.msra.mxu1 %v283_v1  ;;  %4073 = vmatpush3.msra.mxu0 %v283_v1  ;;  %s4582_s14 = smul.u32 432, %s219_s11  ;;  %s215_s11 = sand.u32 1, %s4680_s19  }
  0x18   : > { %4576 = vmatprep.subr.mxu1 %v282_v2  ;;  %4074 = vmatprep.subr.mxu0 %v282_v2  ;;  %s3449_s12 = sshll.u32 %s215_s11, 8  ;;  %s6812_s25 = scalar_lea.sflag [#allocation3], %s215_s11 }
  0x19   : > { %4580 = vmatpush3.msra.mxu1 %v282_v2  ;;  %4075 = vmatpush3.msra.mxu0 %v282_v2  ;;  %s4788_s17 = scalar_lea.vmem %s6852_s0, %s4582_s14  ;;  %s6713_s13 = scalar_lea.vmem [#allocation2], %s3449_s12 }
  0x1a   : > { %4577 = vmatprep.subr.mxu1 %v281_v3  ;;  %4076 = vmatprep.subr.mxu0 %v281_v3  ;;  %v4797_v6 = vld [vmem:[%s4788_s17] sm:$0xff]  ;;  %v4800_v7 = vld [vmem:[%s4788_s17 + $0x8] sm:$0xff]  ;;  %v4812_v13 = vld [vmem:[%s4788_s17 + $0x10] sm:$0x3]  ;;  %s3745_s14 = sshll.u32 %s4744_s22, 12  ;;  %s3383_s15 = sshll.u32 %s6713_s13, 4  ;;  %s6786_s15 = int_to_ptr.vmem [resolvable:$true] %s3383_s15 }
  0x1b   : > { %v4803_v8 = vld [vmem:[%s4788_s17 + $0xc0] sm:$0xff]  ;;  %4581 = vmatpush3.msra.mxu1 %v281_v3  ;;  %4077 = vmatpush3.msra.mxu0 %v281_v3  ;;  %v362_v9 = vrot.slane %v4797_v6, 1  ;;  %v363_v10 = vrot.slane %v4800_v7, 1  ;;  %v4808_v11 = vld [vmem:[%s4788_s17 + $0xc8] sm:$0xff]  ;;  %v365_v15 = vrot.slane %v4812_v13, 1  ;;  %v4820_v17 = vld [vmem:[%s4788_s17 + $0x18] sm:$0xff]  ;;  %s6784_s23 = scalar_lea.hbm %s6857_s5, %s3745_s14 }
  0x1c   : > { %v402_v12 = vrot.slane %v4803_v8, 1  ;;  %v403_v14 = vrot.slane %v4808_v11, 1  ;;  %4126 = vmatprep.subr.mxu1 %v280_v4  ;;  %v4817_v16 = vld [vmem:[%s4788_s17 + $0xd0] sm:$0x3]  ;;  %4182 = vmatprep.subr.mxu0 %v288_v5  ;;  %v4825_v20 = vld [vmem:[%s4788_s17 + $0x20] sm:$0xff]  ;;  %v367_v21 = vrot.slane %v4820_v17, 1 }
  0x1d   : > { %v364_v18 = vsel %vm361_vm0, %v362_v9, %v363_v10  ;;  %v405_v19 = vrot.slane %v4817_v16, 1  ;;  %v4829_v22 = vld [vmem:[%s4788_s17 + $0xd8] sm:$0xff]  ;;  %v4832_v23 = vld [vmem:[%s4788_s17 + $0xe0] sm:$0xff]  ;;  %v366_v26 = vsel %vm361_vm0, %v363_v10, %v365_v15  ;;  %v368_v27 = vrot.slane %v4825_v20, 1  ;;  %v4845_v29 = vld [vmem:[%s4788_s17 + $0x28] sm:$0x3] }
  0x1e   : > { %4078 = vmatprep.mubr.msk.f32.mxu0 %vm442_vm1, %v364_v18  ;;  %v4839_v25 = vsel %vm361_vm0, %v402_v12, %v403_v14  ;;  %v407_v28 = vrot.slane %v4829_v22, 1  ;;  %v4848_v30 = vld [vmem:[%s4788_s17 + $0xe8] sm:$0x3]  ;;  %v408_v32 = vrot.slane %v4832_v23, 1  ;;  %v370_v33 = vrot.slane %v4845_v29, 1  ;;  %v4860_v35 = vld [vmem:[%s4788_s17 + $0x30] sm:$0xff] }
  0x1f   : > { %6942 = vst [vmem:[#allocation5_spill] sm:$0xff] %v4839_v25  ;;  %4102 = vmatprep.mubr.msk.f32.mxu1 %vm442_vm1, %v4839_v25  ;;  %4079 = vmatmul.mubr.msk.f32.vlgmr.msra.gmra.mxu0 %vm442_vm1, %v366_v26  ;;  %v4854_v31 = vsel %vm361_vm0, %v403_v14, %v405_v19  ;;  %v410_v34 = vrot.slane %v4848_v30, 1  ;;  %v4863_v36 = vld [vmem:[%s4788_s17 + $0x38] sm:$0xff]  ;;  %v4866_v37 = vld [vmem:[%s4788_s17 + $0xf0] sm:$0xff]  ;;  %v4871_v38 = vsel %vm361_vm0, %v367_v21, %v368_v27  ;;  %v372_v39 = vrot.slane %v4860_v35, 1  ;;  %v4901_v50 = vld [vmem:[%s4788_s17 + $0x48] sm:$0xff] }
  0x20   : > { %6943 = vst [vmem:[#allocation6_spill] sm:$0xff] %v4854_v31  ;;  %4103 = vmatmul.mubr.msk.f32.vlgmr.msra.gmra.mxu1 %vm442_vm1, %v4854_v31  ;;  %4183 = vmatpush3.msra.mxu0 %v288_v5  ;;  %6944 = vst [vmem:[#allocation7_spill] sm:$0xff] %v4871_v38  ;;  %v373_v40 = vrot.slane %v4863_v36, 1  ;;  %v4876_v41 = vld [vmem:[%s4788_s17 + $0xf8] sm:$0xff]  ;;  %v412_v42 = vrot.slane %v4866_v37, 1  ;;  %v4888_v45 = vsel %vm361_vm0, %v407_v28, %v408_v32  ;;  %v4904_v51 = vld [vmem:[%s4788_s17 + $0x50] sm:$0xff] }
  0x21   : > { %v4880_v43 = vld [vmem:[%s4788_s17 + $0x40] sm:$0x3]  ;;  %4127 = vmatpush3.msra.mxu1 %v280_v4  ;;  %4081 = vmatprep.mubr.msk.f32.mxu0 %vm442_vm1, %v4871_v38  ;;  %6945 = vst [vmem:[#allocation8_spill] sm:$0xff] %v4888_v45  ;;  %v4891_v46 = vsel %vm361_vm0, %v368_v27, %v370_v33  ;;  %v4894_v47 = vsel %vm361_vm0, %v408_v32, %v410_v34  ;;  %v413_v48 = vrot.slane %v4876_v41, 1  ;;  %v377_v56 = vrot.slane %v4901_v50, 1  ;;  %v4918_v57 = vld [vmem:[%s4788_s17 + $0x108] sm:$0xff] }
  0x22   : > { %6946 = vst [vmem:[#allocation9_spill] sm:$0xff] %v4891_v46  ;;  %6947 = vst [vmem:[#allocation10_spill] sm:$0xff] %v4894_v47  ;;  %v4898_v49 = vld [vmem:[%s4788_s17 + $0x100] sm:$0x3]  ;;  %4105 = vmatprep.mubr.msk.f32.mxu1 %vm442_vm1, %v4888_v45  ;;  %v4912_v53 = vsel %vm361_vm0, %v372_v39, %v373_v40  ;;  %4128 = vmatprep.subr.mxu1 %v279_v24  ;;  %v375_v54 = vrot.slane %v4880_v43, 1  ;;  %v4921_v58 = vld [vmem:[%s4788_s17 + $0x110] sm:$0xff] }
  0x23   : > { %6948 = vst [vmem:[#allocation11_spill] sm:$0xff] %v4912_v53  ;;  %v415_v55 = vrot.slane %v4898_v49, 1  ;;  %v4924_v59 = vld [vmem:[%s4788_s17 + $0x60] sm:$0xff]  ;;  %4082 = vmatmul.mubr.msk.f32.gmra.mxu0 %vm442_vm1, %v4891_v46  ;;  %v4929_v60 = vsel %vm361_vm0, %v412_v42, %v413_v48  ;;  %4129 = vmatpush3.msra.mxu1 %v279_v24  ;;  %v378_v61 = vrot.slane %v4904_v51, 1  ;;  %v417_v62 = vrot.slane %v4918_v57, 1  ;;  %v4938_v1 = vld [vmem:[%s4788_s17 + $0x68] sm:$0xff] }
  0x24   : > { %6949 = vst [vmem:[#allocation12_spill] sm:$0xff] %v4929_v60  ;;  %v418_v63 = vrot.slane %v4921_v58, 1  ;;  %v4935_v0 = vld [vmem:[%s4788_s17 + $0x58] sm:$0x3]  ;;  %4106 = vmatmul.mubr.msk.f32.gmra.mxu1 %vm442_vm1, %v4894_v47  ;;  %4084 = vmatprep.mubr.msk.f32.mxu0 %vm442_vm1, %v4912_v53  ;;  %v4945_v2 = vsel %vm361_vm0, %v373_v40, %v375_v54  ;;  %v382_v5 = vrot.slane %v4924_v59, 1  ;;  %v4953_v9 = vld [vmem:[%s4788_s17 + $0x120] sm:$0xff] }
  0x25   : > { %6950 = vst [vmem:[#allocation13_spill] sm:$0xff] %v4945_v2  ;;  %v380_v3 = vrot.slane %v4935_v0, 1  ;;  %v4949_v4 = vld [vmem:[%s4788_s17 + $0x118] sm:$0x3]  ;;  %v4956_v10 = vld [vmem:[%s4788_s17 + $0x128] sm:$0xff]  ;;  %4108 = vmatprep.mubr.msk.f32.mxu1 %vm442_vm1, %v4929_v60  ;;  %v4961_v12 = vsel %vm361_vm0, %v413_v48, %v415_v55  ;;  %4184 = vmatprep.subr.mxu0 %v287_v44  ;;  %v4964_v14 = vsel %vm361_vm0, %v377_v56, %v378_v61  ;;  %v383_v18 = vrot.slane %v4938_v1, 1 }
  0x26   : > { %6951 = vst [vmem:[#allocation14_spill] sm:$0xff] %v4961_v12  ;;  %6952 = vst [vmem:[#allocation15_spill] sm:$0xff] %v4964_v14  ;;  %v420_v15 = vrot.slane %v4949_v4, 1  ;;  %v4969_v19 = vld [vmem:[%s4788_s17 + $0x70] sm:$0x3]  ;;  %4185 = vmatpush3.msra.mxu0 %v287_v44  ;;  %v4975_v24 = vsel %vm361_vm0, %v417_v62, %v418_v63  ;;  %v422_v26 = vrot.slane %v4953_v9, 1  ;;  %4130 = vmatprep.subr.mxu1 %v278_v52 }
  0x27   : > { %v4972_v21 = vld [vmem:[%s4788_s17 + $0x130] sm:$0x3]  ;;  %6953 = vst [vmem:[#allocation16_spill] sm:$0xff] %v4975_v24  ;;  %v423_v27 = vrot.slane %v4956_v10, 1  ;;  %v286_v28 = vld [vmem:[%s6853_s1 + $0x48] sm:$0xff]  ;;  %v4983_v32 = vld [vmem:[%s4788_s17 + $0x78] sm:$0xff]  ;;  %4085 = vmatmul.mubr.msk.f32.gmra.mxu0 %vm442_vm1, %v4945_v2  ;;  %4131 = vmatpush3.msra.mxu1 %v278_v52  ;;  %v5004_v42 = vsel %vm361_vm0, %v378_v61, %v380_v3  ;;  %v5014_v54 = vsel %vm361_vm0, %v382_v5, %v383_v18 }
  0x28   : > { %v4986_v33 = vld [vmem:[%s4788_s17 + $0x80] sm:$0xff]  ;;  %v4991_v34 = vld [vmem:[%s4788_s17 + $0x138] sm:$0xff]  ;;  %4109 = vmatmul.mubr.msk.f32.gmra.mxu1 %vm442_vm1, %v4961_v12  ;;  %4087 = vmatprep.mubr.msk.f32.mxu0 %vm442_vm1, %v4964_v14  ;;  %6954 = vst [vmem:[#allocation17_spill] sm:$0xff] %v5004_v42  ;;  %v385_v44 = vrot.slane %v4969_v19, 1  ;;  %v425_v48 = vrot.slane %v4972_v21, 1  ;;  %v5011_v52 = vsel %vm361_vm0, %v418_v63, %v420_v15  ;;  %6956 = vst [vmem:[#allocation19_spill] sm:$0xff] %v5014_v54 }
  0x29   : > { %v4994_v39 = vld [vmem:[%s4788_s17 + $0x140] sm:$0xff]  ;;  %4111 = vmatprep.mubr.msk.f32.mxu1 %vm442_vm1, %v4975_v24  ;;  %6955 = vst [vmem:[#allocation18_spill] sm:$0xff] %v5011_v52  ;;  %4186 = vmatprep.subr.mxu0 %v286_v28  ;;  %v387_v55 = vrot.slane %v4983_v32, 1  ;;  %v388_v56 = vrot.slane %v4986_v33, 1  ;;  %v5019_v61 = vld [vmem:[%s4788_s17 + $0x88] sm:$0x3]  ;;  %v5025_v3 = vsel %vm361_vm0, %v422_v26, %v423_v27 }
  0x2a   : > { %v277_v40 = vld [vmem:[%s6853_s1] sm:$0xff]  ;;  %v5022_v62 = vld [vmem:[%s4788_s17 + $0x148] sm:$0x3]  ;;  %6957 = vst [vmem:[#allocation20_spill] sm:$0xff] %v5025_v3  ;;  %4187 = vmatpush3.msra.mxu0 %v286_v28  ;;  %v427_v63 = vrot.slane %v4991_v34, 1  ;;  %v428_v15 = vrot.slane %v4994_v39, 1  ;;  %v5056_v47 = vsel %vm361_vm0, %v383_v18, %v385_v44 }
  0x2b   : > { %v5030_v5 = vld [vmem:[%s4788_s17 + $0x90] sm:$0xff]  ;;  %v5033_v24 = vld [vmem:[%s4788_s17 + $0x98] sm:$0xff]  ;;  %4132 = vmatprep.subr.mxu1 %v277_v40  ;;  %v285_v12 = vld [vmem:[%s6853_s1 + $0x40] sm:$0xff]  ;;  %4088 = vmatmul.mubr.msk.f32.gmra.mxu0 %vm442_vm1, %v5004_v42  ;;  %6959 = vst [vmem:[#allocation22_spill] sm:$0xff] %v5056_v47  ;;  %v390_v45 = vrot.slane %v5019_v61, 1  ;;  %v5071_v18 = vsel %vm361_vm0, %v387_v55, %v388_v56  ;;  %s4628_s26 = scalar_lea.vmem %s6786_s15, 4096 }
  0x2c   : > { %v5041_v26 = vld [vmem:[%s4788_s17 + $0x150] sm:$0xff]  ;;  %v5044_v28 = vld [vmem:[%s4788_s17 + $0x158] sm:$0xff]  ;;  %4133 = vmatpush3.msra.mxu1 %v277_v40  ;;  %4090 = vmatprep.mubr.msk.f32.mxu0 %vm442_vm1, %v5014_v54  ;;  %v430_v40 = vrot.slane %v5022_v62, 1  ;;  %6961 = vst [vmem:[#allocation24_spill] sm:$0xff] %v5071_v18  ;;  %v392_v44 = vrot.slane %v5030_v5, 1  ;;  %v393_v25 = vrot.slane %v5033_v24, 1  ;;  %v5079_v42 = vsel %vm361_vm0, %v427_v63, %v428_v15  ;;  %p4629_p11 = scmp.ne.s32.totalorder %s6786_s15, %s4628_s26 }
  0x2d   : > { %6958 = vst [vmem:[#allocation21_spill] sm:$0xff] %v5044_v28  ;;  %v5049_v60 = vld [vmem:[%s6853_s1 + $0x78] sm:$0xff]  ;;  %4112 = vmatmul.mubr.msk.f32.gmra.mxu1 %vm442_vm1, %v5011_v52  ;;  %v5068_v52 = vsel %vm361_vm0, %v423_v27, %v425_v48  ;;  %v5076_v54 = vld [vmem:[%s4788_s17 + $0xa0] sm:$0x3]  ;;  %4188 = vmatprep.subr.mxu0 %v285_v12  ;;  %6962 = vst [vmem:[#allocation25_spill] sm:$0xff] %v5079_v42  ;;  %v433_v14 = vrot.slane %v5044_v28, 1 }
  0x2e   : > { %v5063_v31 = vld [vmem:[%s6853_s1 + $0x98] sm:$0xff]  ;;  %4114 = vmatprep.mubr.msk.f32.mxu1 %vm442_vm1, %v5025_v3  ;;  %6960 = vst [vmem:[#allocation23_spill] sm:$0xff] %v5068_v52  ;;  %v432_v3 = vrot.slane %v5041_v26, 1  ;;  %v5084_v27 = vld [vmem:[%s4788_s17 + $0x160] sm:$0x3]  ;;  %4189 = vmatpush3.msra.mxu0 %v285_v12  ;;  %v5087_v48 = vld [vmem:[%s4788_s17 + $0xa8] sm:$0xff]  ;;  %v5107_v12 = vsel %vm361_vm0, %v388_v56, %v390_v45  ;;  %v5110_v53 = vsel %vm361_vm0, %v428_v15, %v430_v40  ;;  %p4630_p12 = pnand %p4629_p11, %p4761_p5 }
  0x2f   : > { %v5090_v55 = vld [vmem:[%s4788_s17 + $0xb0] sm:$0xff]  ;;  %4238 = vmatprep.subr.mxu1 %v5049_v60  ;;  %4091 = vmatmul.mubr.msk.f32.gmra.mxu0 %vm442_vm1, %v5056_v47  ;;  %v5096_v2 = vld [vmem:[%s4788_s17 + $0x168] sm:$0xff]  ;;  %6964 = vst [vmem:[#allocation27_spill] sm:$0xff] %v5107_v12  ;;  %6965 = vst [vmem:[#allocation28_spill] sm:$0xff] %v5110_v53  ;;  %v395_v47 = vrot.slane %v5076_v54, 1  ;;  %v5116_v46 = vsel %vm361_vm0, %v392_v44, %v393_v25  ;;  %v435_v38 = vrot.slane %v5084_v27, 1 }
  0x30   : > { %v5099_v63 = vld [vmem:[%s4788_s17 + $0x170] sm:$0xff]  ;;  %4294 = vmatprep.subr.mxu0 %v5063_v31  ;;  %4093 = vmatprep.mubr.msk.f32.mxu0 %vm442_vm1, %v5071_v18  ;;  %6966 = vst [vmem:[#allocation29_spill] sm:$0xff] %v5116_v46  ;;  %v398_v18 = vrot.slane %v5090_v55, 1  ;;  %v5122_v28 = vld [vmem:[%s4788_s17 + $0xb8] sm:$0x3]  ;;  %v5125_v45 = vsel %vm361_vm0, %v432_v3, %v433_v14  ;;  %v437_v56 = vrot.slane %v5096_v2, 1  ;;  %p4631_p13 = pneg %p4630_p12 }
  0x31   : > { %6963 = vst [vmem:[#allocation26_spill] sm:$0xff] %v5099_v63  ;;  %4115 = vmatmul.mubr.msk.f32.gmra.mxu1 %vm442_vm1, %v5068_v52  ;;  %v397_v52 = vrot.slane %v5087_v48, 1  ;;  %6967 = vst [vmem:[#allocation30_spill] sm:$0xff] %v5125_v45  ;;  %v438_v15 = vrot.slane %v5099_v63, 1  ;;  %v5130_v40 = vld [vmem:[%s4788_s17 + $0x178] sm:$0x3]  ;;  %v5139_v44 = vsel %vm361_vm0, %v393_v25, %v395_v47  ;;  %v5146_v63 = vsel %vm361_vm0, %v433_v14, %v435_v38 }
  0x32   : > { %4117 = vmatprep.mubr.msk.f32.mxu1 %vm442_vm1, %v5079_v42  ;;  %6968 = vst [vmem:[#allocation31_spill] sm:$0xff] %v5139_v44  ;;  %v400_v3 = vrot.slane %v5122_v28, 1  ;;  %v1022_v42 = vrot.slane %v4797_v6, 2  ;;  %6969 = vst [vmem:[#allocation32_spill] sm:$0xff] %v5146_v63  ;;  %v1025_v47 = vrot.slane %v4812_v13, 2  ;;  %v1027_v13 = vrot.slane %v4820_v17, 2 }
  0x33   : > { %4094 = vmatmul.mubr.msk.f32.gmra.mxu0 %vm442_vm1, %v5107_v12  ;;  %v5149_v12 = vsel %vm361_vm0, %v397_v52, %v398_v18  ;;  %v5154_v25 = vsel %vm361_vm0, %v437_v56, %v438_v15  ;;  %v1028_v56 = vrot.slane %v4825_v20, 2 }
  0x34   : > { %4096 = vmatprep.mubr.msk.f32.mxu0 %vm442_vm1, %v5116_v46  ;;  %6970 = vst [vmem:[#allocation33_spill] sm:$0xff] %v5149_v12  ;;  %v1023_v46 = vrot.slane %v4800_v7, 2  ;;  %6971 = vst [vmem:[#allocation34_spill] sm:$0xff] %v5154_v25  ;;  %v5164_v38 = vsel %vm361_vm0, %v398_v18, %v400_v3  ;;  %v1030_v3 = vrot.slane %v4845_v29, 2  ;;  %v1035_v29 = vrot.slane %v4880_v43, 2 }
  0x35   : > { %4118 = vmatmul.mubr.msk.f32.gmra.mxu1 %vm442_vm1, %v5110_v53  ;;  %v440_v53 = vrot.slane %v5130_v40, 1  ;;  %6972 = vst [vmem:[#allocation35_spill] sm:$0xff] %v5164_v38 }
  0x36   : > { %4120 = vmatprep.mubr.msk.f32.mxu1 %vm442_vm1, %v5125_v45  ;;  %v1024_v52 = vsel %vm1021_vm2, %v1022_v42, %v1023_v46  ;;  %v1026_v18 = vsel %vm1021_vm2, %v1023_v46, %v1025_v47  ;;  %v1033_v42 = vrot.slane %v4863_v36, 2  ;;  %v1037_v47 = vrot.slane %v4901_v50, 2 }
  0x37   : > { %4097 = vmatmul.mubr.msk.f32.gmra.mxu0 %vm442_vm1, %v5139_v44  ;;  %v5169_v14 = vsel %vm361_vm0, %v438_v15, %v440_v53  ;;  %v1032_v53 = vrot.slane %v4860_v35, 2  ;;  %v5187_v15 = vsel %vm1021_vm2, %v1027_v13, %v1028_v56  ;;  %v1038_v13 = vrot.slane %v4904_v51, 2 }
  0x38   : > { %4099 = vmatprep.mubr.msk.f32.mxu0 %vm442_vm1, %v5149_v12  ;;  %6973 = vst [vmem:[#allocation36_spill] sm:$0xff] %v5169_v14  ;;  %v5222_v43 = vsel %vm1021_vm2, %v1033_v42, %v1035_v29 }
  0x39   : > { %4121 = vmatmul.mubr.msk.f32.gmra.mxu1 %vm442_vm1, %v5146_v63  ;;  %v5203_v46 = vsel %vm1021_vm2, %v1032_v53, %v1033_v42  ;;  %v294_v53 = vld [vmem:[%s6853_s1 + $0x88] sm:$0xff] }
  0x3a   : > { %4123 = vmatprep.mubr.msk.f32.mxu1 %vm442_vm1, %v5154_v25 }
  0x3b   : > { %4100 = vmatmul.mubr.msk.f32.gmra.mxu0 %vm442_vm1, %v5164_v38 }
  0x3c   : > { %4190 = vmatprep.mubr.msk.f32.mxu0 %vm442_vm1, %v1024_v52  ;;  %v291_v52 = vld [vmem:[%s6853_s1 + $0x70] sm:$0xff] }
  0x3d   : > { %4124 = vmatmul.mubr.msk.f32.gmra.mxu1 %vm442_vm1, %v5169_v14 }
  0x3e   : > { %4134 = vmatprep.mubr.msk.f32.mxu1 %vm442_vm1, %v4797_v6  ;;  %v5196_v6 = vsel %vm1021_vm2, %v1028_v56, %v1030_v3  ;;  %v5228_v56 = vsel %vm1021_vm2, %v1037_v47, %v1038_v13  ;;  %v1043_v3 = vrot.slane %v4938_v1, 2  ;;  %v1047_v47 = vrot.slane %v4983_v32, 2 }
  0x3f   : > { %4191 = vmatmul.mubr.msk.f32.vlgmr.msra.gmra.mxu0 %vm442_vm1, %v1026_v18  ;;  %v1042_v18 = vrot.slane %v4924_v59, 2 }
  0x40   : > { %4295 = vmatpush3.msra.mxu0 %v5063_v31  ;;  %4193 = vmatprep.mubr.msk.f32.mxu0 %vm442_vm1, %v5187_v15  ;;  %v290_v31 = vld [vmem:[%s6853_s1 + $0x68] sm:$0xff] }
  0x41   : > { %4135 = vmatmul.mubr.msk.f32.vlgmr.msra.gmra.mxu1 %vm442_vm1, %v4800_v7  ;;  %v295_v7 = vld [vmem:[%s6853_s1 + $0x90] sm:$0xff]  ;;  %v5251_v29 = vsel %vm1021_vm2, %v1042_v18, %v1043_v3  ;;  %v5276_v18 = vld [vmem:[%s6853_s1 + $0xd8] sm:$0xff] }
  0x42   : > { %4239 = vmatpush3.msra.mxu1 %v5049_v60  ;;  %4137 = vmatprep.mubr.msk.f32.mxu1 %vm442_vm1, %v4820_v17  ;;  %v1040_v60 = vrot.slane %v4935_v0, 2  ;;  %v289_v0 = vld [vmem:[%s6853_s1 + $0x60] sm:$0xff]  ;;  %6974 = vst [vmem:[#allocation37_spill] sm:$0xff] %v5251_v29 }
  0x43   : > { %4240 = vmatprep.subr.mxu1 %v291_v52  ;;  %4194 = vmatmul.mubr.msk.f32.gmra.mxu0 %vm442_vm1, %v5196_v6 }
  0x44   : > { %4241 = vmatpush3.msra.mxu1 %v291_v52  ;;  %4196 = vmatprep.mubr.msk.f32.mxu0 %vm442_vm1, %v5203_v46  ;;  %v5245_v42 = vsel %vm1021_vm2, %v1038_v13, %v1040_v60  ;;  %v1045_v52 = vrot.slane %v4969_v19, 2  ;;  %v293_v13 = vld [vmem:[%s6853_s1 + $0x80] sm:$0xff]  ;;  %v5263_v19 = vld [vmem:[%s6853_s1 + $0xb8] sm:$0xff]  ;;  %v1050_v60 = vrot.slane %v5019_v61, 2 }
  0x45   : > { %4138 = vmatmul.mubr.msk.f32.gmra.mxu1 %vm442_vm1, %v4825_v20  ;;  %4296 = vmatprep.subr.mxu0 %v295_v7 }
  0x46   : > { %4140 = vmatprep.mubr.msk.f32.mxu1 %vm442_vm1, %v4860_v35  ;;  %4297 = vmatpush3.msra.mxu0 %v295_v7  ;;  %v1048_v7 = vrot.slane %v4986_v33, 2 }
  0x47   : > { %4242 = vmatprep.subr.mxu1 %v290_v31  ;;  %4197 = vmatmul.mubr.msk.f32.gmra.mxu0 %vm442_vm1, %v5222_v43 }
  0x48   : > { %4243 = vmatpush3.msra.mxu1 %v290_v31  ;;  %4199 = vmatprep.mubr.msk.f32.mxu0 %vm442_vm1, %v5228_v56  ;;  %v5270_v31 = vsel %vm1021_vm2, %v1043_v3, %v1045_v52  ;;  %v5294_v61 = vsel %vm1021_vm2, %v1048_v7, %v1050_v60  ;;  %v1055_v3 = vrot.slane %v5076_v54, 2 }
  0x49   : > { %4141 = vmatmul.mubr.msk.f32.gmra.mxu1 %vm442_vm1, %v4863_v36  ;;  %4298 = vmatprep.subr.mxu0 %v294_v53  ;;  %6975 = vst [vmem:[#allocation38_spill] sm:$0xff] %v5294_v61 }
  0x4a   : > { %4143 = vmatprep.mubr.msk.f32.mxu1 %vm442_vm1, %v4901_v50  ;;  %4299 = vmatpush3.msra.mxu0 %v294_v53  ;;  %v5281_v53 = vsel %vm1021_vm2, %v1047_v47, %v1048_v7  ;;  %v1057_v47 = vrot.slane %v5087_v48, 2  ;;  %v1060_v7 = vrot.slane %v5122_v28, 2 }
  0x4b   : > { %4244 = vmatprep.subr.mxu1 %v289_v0  ;;  %4200 = vmatmul.mubr.msk.f32.gmra.mxu0 %vm442_vm1, %v5245_v42 }
  0x4c   : > { %4245 = vmatpush3.msra.mxu1 %v289_v0  ;;  %4202 = vmatprep.mubr.msk.f32.mxu0 %vm442_vm1, %v5251_v29  ;;  %v1052_v0 = vrot.slane %v5030_v5, 2  ;;  %v1053_v29 = vrot.slane %v5033_v24, 2 }
  0x4d   : > { %4144 = vmatmul.mubr.msk.f32.gmra.mxu1 %vm442_vm1, %v4904_v51  ;;  %4300 = vmatprep.subr.mxu0 %v293_v13 }
  0x4e   : > { %4146 = vmatprep.mubr.msk.f32.mxu1 %vm442_vm1, %v4924_v59  ;;  %4301 = vmatpush3.msra.mxu0 %v293_v13  ;;  %v5300_v52 = vsel %vm1021_vm2, %v1052_v0, %v1053_v29  ;;  %v1058_v13 = vrot.slane %v5090_v55, 2  ;;  %v5311_v54 = vsel %vm1021_vm2, %v1053_v29, %v1055_v3  ;;  %v1062_v0 = vrot.slane %v4803_v8, 2 }
  0x4f   : > { %4350 = vmatprep.subr.mxu1 %v5263_v19  ;;  %4203 = vmatmul.mubr.msk.f32.gmra.mxu0 %vm442_vm1, %v5270_v31  ;;  %6976 = vst [vmem:[#allocation39_spill] sm:$0xff] %v5311_v54  ;;  %v1065_v29 = vrot.slane %v4817_v16, 2 }
  0x50   : > { %4406 = vmatprep.subr.mxu0 %v5276_v18  ;;  %4205 = vmatprep.mubr.msk.f32.mxu0 %vm442_vm1, %v5281_v53  ;;  %v5317_v60 = vsel %vm1021_vm2, %v1057_v47, %v1058_v13  ;;  %v5328_v28 = vsel %vm1021_vm2, %v1058_v13, %v1060_v7  ;;  %v1067_v47 = vrot.slane %v4829_v22, 2  ;;  %v1070_v13 = vrot.slane %v4848_v30, 2 }
  0x51   : > { %4147 = vmatmul.mubr.msk.f32.gmra.mxu1 %vm442_vm1, %v4938_v1  ;;  %6977 = vst [vmem:[#allocation40_spill] sm:$0xff] %v5328_v28 }
  0x52   : > { %4149 = vmatprep.mubr.msk.f32.mxu1 %vm442_vm1, %v4983_v32 }
  0x53   : > { %4206 = vmatmul.mubr.msk.f32.gmra.mxu0 %vm442_vm1, %v5294_v61  ;;  %v1063_v61 = vrot.slane %v4808_v11, 2 }
  0x54   : > { %4208 = vmatprep.mubr.msk.f32.mxu0 %vm442_vm1, %v5300_v52 }
  0x55   : > { %4150 = vmatmul.mubr.msk.f32.gmra.mxu1 %vm442_vm1, %v4986_v33  ;;  %v5334_v3 = vsel %vm1021_vm2, %v1062_v0, %v1063_v61  ;;  %v5345_v16 = vsel %vm1021_vm2, %v1063_v61, %v1065_v29  ;;  %v1072_v0 = vrot.slane %v4866_v37, 2  ;;  %v1075_v61 = vrot.slane %v4898_v49, 2 }
  0x56   : > { %4152 = vmatprep.mubr.msk.f32.mxu1 %vm442_vm1, %v5030_v5  ;;  %6978 = vst [vmem:[#allocation41_spill] sm:$0xff] %v5345_v16 }
  0x57   : > { %4209 = vmatmul.mubr.msk.f32.gmra.mxu0 %vm442_vm1, %v5311_v54  ;;  %v1068_v54 = vrot.slane %v4832_v23, 2 }
  0x58   : > { %4211 = vmatprep.mubr.msk.f32.mxu0 %vm442_vm1, %v5317_v60 }
  0x59   : > { %4153 = vmatmul.mubr.msk.f32.gmra.mxu1 %vm442_vm1, %v5033_v24  ;;  %v5351_v7 = vsel %vm1021_vm2, %v1067_v47, %v1068_v54  ;;  %v5362_v30 = vsel %vm1021_vm2, %v1068_v54, %v1070_v13  ;;  %v1077_v47 = vrot.slane %v4918_v57, 2  ;;  %v1080_v54 = vrot.slane %v4949_v4, 2 }
  0x5a   : > { %4155 = vmatprep.mubr.msk.f32.mxu1 %vm442_vm1, %v5087_v48  ;;  %6979 = vst [vmem:[#allocation42_spill] sm:$0xff] %v5362_v30 }
  0x5b   : > { %4212 = vmatmul.mubr.msk.f32.gmra.mxu0 %vm442_vm1, %v5328_v28  ;;  %v1073_v28 = vrot.slane %v4876_v41, 2 }
  0x5c   : > { %4214 = vmatprep.mubr.msk.f32.mxu0 %vm442_vm1, %v5334_v3 }
  0x5d   : > { %4156 = vmatmul.mubr.msk.f32.gmra.mxu1 %vm442_vm1, %v5090_v55  ;;  %v5368_v29 = vsel %vm1021_vm2, %v1072_v0, %v1073_v28  ;;  %v5379_v49 = vsel %vm1021_vm2, %v1073_v28, %v1075_v61  ;;  %v1082_v0 = vrot.slane %v4953_v9, 2  ;;  %v1085_v28 = vrot.slane %v4972_v21, 2 }
  0x5e   : > { %4158 = vmatprep.mubr.msk.f32.mxu1 %vm442_vm1, %v4803_v8  ;;  %6980 = vst [vmem:[#allocation43_spill] sm:$0xff] %v5379_v49 }
  0x5f   : > { %4215 = vmatmul.mubr.msk.f32.gmra.mxu0 %vm442_vm1, %v5345_v16  ;;  %v1078_v16 = vrot.slane %v4921_v58, 2 }
  0x60   : > { %4217 = vmatprep.mubr.msk.f32.mxu0 %vm442_vm1, %v5351_v7 }
  0x61   : > { %4159 = vmatmul.mubr.msk.f32.gmra.mxu1 %vm442_vm1, %v4808_v11  ;;  %v5385_v13 = vsel %vm1021_vm2, %v1077_v47, %v1078_v16  ;;  %v5396_v4 = vsel %vm1021_vm2, %v1078_v16, %v1080_v54  ;;  %v1087_v47 = vrot.slane %v4991_v34, 2  ;;  %v1090_v16 = vrot.slane %v5022_v62, 2 }
  0x62   : > { %4161 = vmatprep.mubr.msk.f32.mxu1 %vm442_vm1, %v4829_v22  ;;  %6981 = vst [vmem:[#allocation44_spill] sm:$0xff] %v5385_v13  ;;  %6982 = vst [vmem:[#allocation45_spill] sm:$0xff] %v5396_v4 }
  0x63   : > { %4218 = vmatmul.mubr.msk.f32.gmra.mxu0 %vm442_vm1, %v5362_v30  ;;  %v1083_v30 = vrot.slane %v4956_v10, 2 }
  0x64   : > { %4220 = vmatprep.mubr.msk.f32.mxu0 %vm442_vm1, %v5368_v29 }
  0x65   : > { %4162 = vmatmul.mubr.msk.f32.gmra.mxu1 %vm442_vm1, %v4832_v23  ;;  %v5402_v61 = vsel %vm1021_vm2, %v1082_v0, %v1083_v30  ;;  %v5413_v21 = vsel %vm1021_vm2, %v1083_v30, %v1085_v28  ;;  %v1092_v0 = vrot.slane %v5041_v26, 2  ;;  %v1095_v30 = vrot.slane %v5084_v27, 2 }
  0x66   : > { %4164 = vmatprep.mubr.msk.f32.mxu1 %vm442_vm1, %v4866_v37  ;;  %6983 = vst [vmem:[#allocation46_spill] sm:$0xff] %v5402_v61  ;;  %6984 = vst [vmem:[#allocation47_spill] sm:$0xff] %v5413_v21 }
  0x67   : > { %4221 = vmatmul.mubr.msk.f32.gmra.mxu0 %vm442_vm1, %v5379_v49  ;;  %v1088_v49 = vrot.slane %v4994_v39, 2 }
  0x68   : > { %4223 = vmatprep.mubr.msk.f32.mxu0 %vm442_vm1, %v5385_v13 }
  0x69   : > { %4165 = vmatmul.mubr.msk.f32.gmra.mxu1 %vm442_vm1, %v4876_v41  ;;  %v5419_v54 = vsel %vm1021_vm2, %v1087_v47, %v1088_v49  ;;  %v5430_v62 = vsel %vm1021_vm2, %v1088_v49, %v1090_v16  ;;  %v1097_v47 = vrot.slane %v5096_v2, 2  ;;  %v1100_v49 = vrot.slane %v5130_v40, 2  ;;  %v6988_v40 = vld [vmem:[#allocation7_spill] sm:$0xff] }
  0x6a   : > { %4167 = vmatprep.mubr.msk.f32.mxu1 %vm442_vm1, %v4918_v57 }
  0x6b   : > { %4224 = vmatmul.mubr.msk.f32.gmra.mxu0 %vm442_vm1, %v5396_v4  ;;  %v6985_v4 = vld [vmem:[#allocation21_spill] sm:$0xff] }
  0x6c   : > { %4226 = vmatprep.mubr.msk.f32.mxu0 %vm442_vm1, %v5402_v61  ;;  %v1093_v13 = vrot.slane %v6985_v4, 2 }
  0x6d   : > { %4168 = vmatmul.mubr.msk.f32.gmra.mxu1 %vm442_vm1, %v4921_v58 }
  0x6e   : > { %4170 = vmatprep.mubr.msk.f32.mxu1 %vm442_vm1, %v4953_v9  ;;  %v5436_v28 = vsel %vm1021_vm2, %v1092_v0, %v1093_v13  ;;  %v5447_v27 = vsel %vm1021_vm2, %v1093_v13, %v1095_v30  ;;  %v6989_v0 = vld [vmem:[#allocation9_spill] sm:$0xff]  ;;  %v6990_v30 = vld [vmem:[#allocation11_spill] sm:$0xff] }
  0x6f   : > { %4227 = vmatmul.mubr.msk.f32.gmra.mxu0 %vm442_vm1, %v5413_v21  ;;  %v6986_v21 = vld [vmem:[#allocation26_spill] sm:$0xff] }
  0x70   : > { %4229 = vmatprep.mubr.msk.f32.mxu0 %vm442_vm1, %v5419_v54  ;;  %v1098_v61 = vrot.slane %v6986_v21, 2 }
  0x71   : > { %4171 = vmatmul.mubr.msk.f32.gmra.mxu1 %vm442_vm1, %v4956_v10 }
  0x72   : > { %4173 = vmatprep.mubr.msk.f32.mxu1 %vm442_vm1, %v4991_v34  ;;  %v5453_v16 = vsel %vm1021_vm2, %v1097_v47, %v1098_v61  ;;  %v5462_v13 = vsel %vm1021_vm2, %v1098_v61, %v1100_v49  ;;  %v299_v61 = vld [vmem:[%s6853_s1 + $0xb0] sm:$0xff]  ;;  %v6991_v47 = vld [vmem:[#allocation13_spill] sm:$0xff] }
  0x73   : > { %4230 = vmatmul.mubr.msk.f32.gmra.mxu0 %vm442_vm1, %v5430_v62  ;;  %6987 = vst [vmem:[#allocation21_spill] sm:$0xff] %v5462_v13  ;;  %v6993_v49 = vld [vmem:[#allocation17_spill] sm:$0xff] }
  0x74   : > { %4232 = vmatprep.mubr.msk.f32.mxu0 %vm442_vm1, %v5436_v28 }
  0x75   : > { %4174 = vmatmul.mubr.msk.f32.gmra.mxu1 %vm442_vm1, %v4994_v39 }
  0x76   : > { %4176 = vmatprep.mubr.msk.f32.mxu1 %vm442_vm1, %v5041_v26 }
  0x77   : > { %4233 = vmatmul.mubr.msk.f32.gmra.mxu0 %vm442_vm1, %v5447_v27 }
  0x78   : > { %4235 = vmatprep.mubr.msk.f32.mxu0 %vm442_vm1, %v5453_v16 }
  0x79   : > { %4177 = vmatmul.mubr.msk.f32.gmra.mxu1 %vm442_vm1, %v6985_v4 }
  0x7a   : > { %4179 = vmatprep.mubr.msk.f32.mxu1 %vm442_vm1, %v5096_v2 }
  0x7b   : > { %4236 = vmatmul.mubr.msk.f32.gmra.mxu0 %vm442_vm1, %v5462_v13 }
  0x7c   : > { %4302 = vmatprep.mubr.msk.f32.mxu0 %vm442_vm1, %v6988_v40  ;;  %v297_v40 = vld [vmem:[%s6853_s1 + $0xa0] sm:$0xff] }
  0x7d   : > { %4180 = vmatmul.mubr.msk.f32.gmra.mxu1 %vm442_vm1, %v6986_v21 }
  0x7e   : > { %4246 = vmatprep.mubr.msk.f32.mxu1 %vm442_vm1, %v4820_v17  ;;  %v303_v17 = vld [vmem:[%s6853_s1 + $0xd0] sm:$0xff] }
  0x7f   : > { %4303 = vmatmul.mubr.msk.f32.vlgmr.msra.gmra.mxu0 %vm442_vm1, %v6989_v0  ;;  %v6994_v0 = vld [vmem:[#allocation19_spill] sm:$0xff] }
  0x80   : > { %4407 = vmatpush3.msra.mxu0 %v5276_v18  ;;  %4305 = vmatprep.mubr.msk.f32.mxu0 %vm442_vm1, %v6990_v30  ;;  %v302_v18 = vld [vmem:[%s6853_s1 + $0xc8] sm:$0xff] }
  0x81   : > { %4247 = vmatmul.mubr.msk.f32.vlgmr.msra.gmra.mxu1 %vm442_vm1, %v4825_v20  ;;  %v298_v20 = vld [vmem:[%s6853_s1 + $0xa8] sm:$0xff]  ;;  %4408 = vmatprep.subr.mxu0 %v303_v17 }
  0x82   : > { %4351 = vmatpush3.msra.mxu1 %v5263_v19  ;;  %4249 = vmatprep.mubr.msk.f32.mxu1 %vm442_vm1, %v4860_v35  ;;  %v6992_v19 = vld [vmem:[#allocation15_spill] sm:$0xff] }
  0x83   : > { %4352 = vmatprep.subr.mxu1 %v299_v61  ;;  %4306 = vmatmul.mubr.msk.f32.gmra.mxu0 %vm442_vm1, %v6991_v47 }
  0x84   : > { %4353 = vmatpush3.msra.mxu1 %v299_v61  ;;  %4308 = vmatprep.mubr.msk.f32.mxu0 %vm442_vm1, %v6992_v19  ;;  %v301_v61 = vld [vmem:[%s6853_s1 + $0xc0] sm:$0xff] }
  0x85   : > { %4250 = vmatmul.mubr.msk.f32.gmra.mxu1 %vm442_vm1, %v4863_v36  ;;  %4409 = vmatpush3.msra.mxu0 %v303_v17  ;;  %v6995_v17 = vld [vmem:[#allocation22_spill] sm:$0xff] }
  0x86   : > { %4252 = vmatprep.mubr.msk.f32.mxu1 %vm442_vm1, %v4901_v50  ;;  %4354 = vmatprep.subr.mxu1 %v298_v20 }
  0x87   : > { %4309 = vmatmul.mubr.msk.f32.gmra.mxu0 %vm442_vm1, %v6993_v49  ;;  %4355 = vmatpush3.msra.mxu1 %v298_v20  ;;  %v5523_v20 = vld [vmem:[%s6853_s1 + $0xf8] sm:$0xff] }
  0x88   : > { %4311 = vmatprep.mubr.msk.f32.mxu0 %vm442_vm1, %v6994_v0  ;;  %4410 = vmatprep.subr.mxu0 %v302_v18  ;;  %v6996_v0 = vld [vmem:[#allocation24_spill] sm:$0xff] }
  0x89   : > { %4253 = vmatmul.mubr.msk.f32.gmra.mxu1 %vm442_vm1, %v4904_v51  ;;  %4411 = vmatpush3.msra.mxu0 %v302_v18  ;;  %v5532_v18 = vld [vmem:[%s6853_s1 + $0x118] sm:$0xff] }
  0x8a   : > { %4255 = vmatprep.mubr.msk.f32.mxu1 %vm442_vm1, %v4924_v59  ;;  %4356 = vmatprep.subr.mxu1 %v297_v40 }
  0x8b   : > { %4312 = vmatmul.mubr.msk.f32.gmra.mxu0 %vm442_vm1, %v6995_v17  ;;  %4357 = vmatpush3.msra.mxu1 %v297_v40  ;;  %v6997_v40 = vld [vmem:[#allocation27_spill] sm:$0xff] }
  0x8c   : > { %4314 = vmatprep.mubr.msk.f32.mxu0 %vm442_vm1, %v6996_v0  ;;  %4412 = vmatprep.subr.mxu0 %v301_v61  ;;  %v6998_v0 = vld [vmem:[#allocation29_spill] sm:$0xff] }
  0x8d   : > { %4256 = vmatmul.mubr.msk.f32.gmra.mxu1 %vm442_vm1, %v4938_v1  ;;  %4413 = vmatpush3.msra.mxu0 %v301_v61  ;;  %v6999_v61 = vld [vmem:[#allocation5_spill] sm:$0xff] }
  0x8e   : > { %4258 = vmatprep.mubr.msk.f32.mxu1 %vm442_vm1, %v4983_v32  ;;  %4462 = vmatprep.subr.mxu1 %v5523_v20 }
  0x8f   : > { %4315 = vmatmul.mubr.msk.f32.gmra.mxu0 %vm442_vm1, %v6997_v40  ;;  %4518 = vmatprep.subr.mxu0 %v5532_v18  ;;  %v5619_v40 = vld [vmem:[%s4788_s17 + $0x190] sm:$0x3] }
  0x90   : > { %4317 = vmatprep.mubr.msk.f32.mxu0 %vm442_vm1, %v6998_v0  ;;  %v5606_v0 = vld [vmem:[%s4788_s17 + $0x188] sm:$0xff] }
  0x91   : > { %4259 = vmatmul.mubr.msk.f32.gmra.mxu1 %vm442_vm1, %v4986_v33 }
  0x92   : > { %4261 = vmatprep.mubr.msk.f32.mxu1 %vm442_vm1, %v5030_v5 }
  0x93   : > { %4318 = vmatmul.mubr.msk.f32.gmra.mxu0 %vm442_vm1, %v5139_v44  ;;  %v7000_v44 = vld [vmem:[#allocation6_spill] sm:$0xff] }
  0x94   : > { %4320 = vmatprep.mubr.msk.f32.mxu0 %vm442_vm1, %v5149_v12  ;;  %v7001_v12 = vld [vmem:[#allocation8_spill] sm:$0xff] }
  0x95   : > { %4262 = vmatmul.mubr.msk.f32.gmra.mxu1 %vm442_vm1, %v5033_v24 }
  0x96   : > { %4264 = vmatprep.mubr.msk.f32.mxu1 %vm442_vm1, %v5087_v48 }
  0x97   : > { %4321 = vmatmul.mubr.msk.f32.gmra.mxu0 %vm442_vm1, %v5164_v38  ;;  %v7002_v38 = vld [vmem:[#allocation10_spill] sm:$0xff] }
  0x98   : > { %4323 = vmatprep.mubr.msk.f32.mxu0 %vm442_vm1, %v6999_v61  ;;  %v7003_v61 = vld [vmem:[#allocation12_spill] sm:$0xff] }
  0x99   : > { %4265 = vmatmul.mubr.msk.f32.gmra.mxu1 %vm442_vm1, %v5090_v55 }
  0x9a   : > { %4267 = vmatprep.mubr.msk.f32.mxu1 %vm442_vm1, %v4803_v8 }
  0x9b   : > { %4324 = vmatmul.mubr.msk.f32.gmra.mxu0 %vm442_vm1, %v7000_v44  ;;  %v7004_v44 = vld [vmem:[#allocation14_spill] sm:$0xff] }
  0x9c   : > { %4326 = vmatprep.mubr.msk.f32.mxu0 %vm442_vm1, %v7001_v12  ;;  %v7005_v12 = vld [vmem:[#allocation16_spill] sm:$0xff] }
  0x9d   : > { %4268 = vmatmul.mubr.msk.f32.gmra.mxu1 %vm442_vm1, %v4808_v11 }
  0x9e   : > { %4270 = vmatprep.mubr.msk.f32.mxu1 %vm442_vm1, %v4829_v22 }
  0x9f   : > { %4327 = vmatmul.mubr.msk.f32.gmra.mxu0 %vm442_vm1, %v7002_v38  ;;  %v7006_v38 = vld [vmem:[#allocation18_spill] sm:$0xff] }
  0xa0   : > { %4329 = vmatprep.mubr.msk.f32.mxu0 %vm442_vm1, %v7003_v61  ;;  %v7007_v61 = vld [vmem:[#allocation20_spill] sm:$0xff] }
  0xa1   : > { %4271 = vmatmul.mubr.msk.f32.gmra.mxu1 %vm442_vm1, %v4832_v23 }
  0xa2   : > { %4273 = vmatprep.mubr.msk.f32.mxu1 %vm442_vm1, %v4866_v37 }
  0xa3   : > { %4330 = vmatmul.mubr.msk.f32.gmra.mxu0 %vm442_vm1, %v7004_v44  ;;  %v7008_v44 = vld [vmem:[#allocation23_spill] sm:$0xff] }
  0xa4   : > { %4332 = vmatprep.mubr.msk.f32.mxu0 %vm442_vm1, %v7005_v12  ;;  %v7009_v12 = vld [vmem:[#allocation25_spill] sm:$0xff] }
  0xa5   : > { %4274 = vmatmul.mubr.msk.f32.gmra.mxu1 %vm442_vm1, %v4876_v41 }
  0xa6   : > { %4276 = vmatprep.mubr.msk.f32.mxu1 %vm442_vm1, %v4918_v57 }
  0xa7   : > { %4333 = vmatmul.mubr.msk.f32.gmra.mxu0 %vm442_vm1, %v7006_v38  ;;  %v5603_v38 = vld [vmem:[%s4788_s17 + $0x180] sm:$0xff] }
  0xa8   : > { %4335 = vmatprep.mubr.msk.f32.mxu0 %vm442_vm1, %v7007_v61  ;;  %v7010_v61 = vld [vmem:[#allocation28_spill] sm:$0xff] }
  0xa9   : > { %4277 = vmatmul.mubr.msk.f32.gmra.mxu1 %vm442_vm1, %v4921_v58 }
  0xaa   : > { %4279 = vmatprep.mubr.msk.f32.mxu1 %vm442_vm1, %v4953_v9 }
  0xab   : > { %4336 = vmatmul.mubr.msk.f32.gmra.mxu0 %vm442_vm1, %v7008_v44  ;;  %v1688_v44 = vrot.slane %v5606_v0, 1 }
  0xac   : > { %4338 = vmatprep.mubr.msk.f32.mxu0 %vm442_vm1, %v7009_v12  ;;  %v1687_v12 = vrot.slane %v5603_v38, 1 }
  0xad   : > { %4280 = vmatmul.mubr.msk.f32.gmra.mxu1 %vm442_vm1, %v4956_v10 }
  0xae   : > { %4282 = vmatprep.mubr.msk.f32.mxu1 %vm442_vm1, %v4991_v34 }
  0xaf   : > { %4339 = vmatmul.mubr.msk.f32.gmra.mxu0 %vm442_vm1, %v7010_v61  ;;  %v5631_v61 = vsel %vm361_vm0, %v1687_v12, %v1688_v44  ;;  %v307_v12 = vld [vmem:[%s6853_s1 + $0xf0] sm:$0xff] }
  0xb0   : > { %4341 = vmatprep.mubr.msk.f32.mxu0 %vm442_vm1, %v5125_v45  ;;  %v1690_v45 = vrot.slane %v5619_v40, 1  ;;  %7011 = vst [vmem:[#allocation26_spill] sm:$0xff] %v5631_v61 }
  0xb1   : > { %4283 = vmatmul.mubr.msk.f32.gmra.mxu1 %vm442_vm1, %v4994_v39 }
  0xb2   : > { %4285 = vmatprep.mubr.msk.f32.mxu1 %vm442_vm1, %v5041_v26 }
  0xb3   : > { %4342 = vmatmul.mubr.msk.f32.gmra.mxu0 %vm442_vm1, %v5146_v63  ;;  %v5640_v63 = vsel %vm361_vm0, %v1688_v44, %v1690_v45  ;;  %v7020_v45 = vld [vmem:[#allocation44_spill] sm:$0xff] }
  0xb4   : > { %4344 = vmatprep.mubr.msk.f32.mxu0 %vm442_vm1, %v5154_v25  ;;  %7012 = vst [vmem:[#allocation7_spill] sm:$0xff] %v5640_v63 }
  0xb5   : > { %4286 = vmatmul.mubr.msk.f32.gmra.mxu1 %vm442_vm1, %v6985_v4 }
  0xb6   : > { %4288 = vmatprep.mubr.msk.f32.mxu1 %vm442_vm1, %v5096_v2 }
  0xb7   : > { %4345 = vmatmul.mubr.msk.f32.gmra.mxu0 %vm442_vm1, %v5169_v14  ;;  %v5833_v14 = vld [vmem:[%s4788_s17 + $0x198] sm:$0xff] }
  0xb8   : > { %4347 = vmatprep.mubr.msk.f32.mxu0 %vm442_vm1, %v5631_v61 }
  0xb9   : > { %4289 = vmatmul.mubr.msk.f32.gmra.mxu1 %vm442_vm1, %v6986_v21 }
  0xba   : > { %4291 = vmatprep.mubr.msk.f32.mxu1 %vm442_vm1, %v5603_v38 }
  0xbb   : > { %4348 = vmatmul.mubr.msk.f32.gmra.mxu0 %vm442_vm1, %v5640_v63 }
  0xbc   : > { %4414 = vmatprep.mubr.msk.f32.mxu0 %vm442_vm1, %v4860_v35  ;;  %v311_v35 = vld [vmem:[%s6853_s1 + $0x110] sm:$0xff] }
  0xbd   : > { %4292 = vmatmul.mubr.msk.f32.gmra.mxu1 %vm442_vm1, %v5606_v0 }
  0xbe   : > { %4358 = vmatprep.mubr.msk.f32.mxu1 %vm442_vm1, %v5187_v15 }
  0xbf   : > { %4415 = vmatmul.mubr.msk.f32.vlgmr.msra.gmra.mxu0 %vm442_vm1, %v4863_v36  ;;  %v306_v36 = vld [vmem:[%s6853_s1 + $0xe8] sm:$0xff] }
  0xc0   : > { %4519 = vmatpush3.msra.mxu0 %v5532_v18  ;;  %4417 = vmatprep.mubr.msk.f32.mxu0 %vm442_vm1, %v4901_v50  ;;  %v310_v50 = vld [vmem:[%s6853_s1 + $0x108] sm:$0xff] }
  0xc1   : > { %4359 = vmatmul.mubr.msk.f32.vlgmr.msra.gmra.mxu1 %vm442_vm1, %v5196_v6  ;;  %4520 = vmatprep.subr.mxu0 %v311_v35  ;;  %v7021_v6 = vld [vmem:[#allocation45_spill] sm:$0xff] }
  0xc2   : > { %4463 = vmatpush3.msra.mxu1 %v5523_v20  ;;  %4361 = vmatprep.mubr.msk.f32.mxu1 %vm442_vm1, %v5203_v46  ;;  %v7022_v20 = vld [vmem:[#allocation46_spill] sm:$0xff] }
  0xc3   : > { %4464 = vmatprep.subr.mxu1 %v307_v12  ;;  %4418 = vmatmul.mubr.msk.f32.gmra.mxu0 %vm442_vm1, %v4904_v51  ;;  %v305_v51 = vld [vmem:[%s6853_s1 + $0xe0] sm:$0xff] }
  0xc4   : > { %4465 = vmatpush3.msra.mxu1 %v307_v12  ;;  %4420 = vmatprep.mubr.msk.f32.mxu0 %vm442_vm1, %v4924_v59  ;;  %v7013_v59 = vld [vmem:[#allocation37_spill] sm:$0xff] }
  0xc5   : > { %4362 = vmatmul.mubr.msk.f32.gmra.mxu1 %vm442_vm1, %v5222_v43  ;;  %4521 = vmatpush3.msra.mxu0 %v311_v35  ;;  %v7023_v35 = vld [vmem:[#allocation47_spill] sm:$0xff] }
  0xc6   : > { %4364 = vmatprep.mubr.msk.f32.mxu1 %vm442_vm1, %v5228_v56  ;;  %4466 = vmatprep.subr.mxu1 %v306_v36 }
  0xc7   : > { %4421 = vmatmul.mubr.msk.f32.gmra.mxu0 %vm442_vm1, %v4938_v1  ;;  %4467 = vmatpush3.msra.mxu1 %v306_v36  ;;  %v309_v1 = vld [vmem:[%s6853_s1 + $0x100] sm:$0xff] }
  0xc8   : > { %4423 = vmatprep.mubr.msk.f32.mxu0 %vm442_vm1, %v4983_v32  ;;  %4522 = vmatprep.subr.mxu0 %v310_v50  ;;  %v7014_v32 = vld [vmem:[#allocation38_spill] sm:$0xff] }
  0xc9   : > { %4365 = vmatmul.mubr.msk.f32.gmra.mxu1 %vm442_vm1, %v5245_v42  ;;  %4523 = vmatpush3.msra.mxu0 %v310_v50 }
  0xca   : > { %4367 = vmatprep.mubr.msk.f32.mxu1 %vm442_vm1, %v7013_v59  ;;  %4468 = vmatprep.subr.mxu1 %v305_v51 }
  0xcb   : > { %4424 = vmatmul.mubr.msk.f32.gmra.mxu0 %vm442_vm1, %v4986_v33  ;;  %4469 = vmatpush3.msra.mxu1 %v305_v51  ;;  %v7015_v33 = vld [vmem:[#allocation39_spill] sm:$0xff]  ;;  %v1953_v51 = vrot.slane %v5603_v38, 2 }
  0xcc   : > { %4426 = vmatprep.mubr.msk.f32.mxu0 %vm442_vm1, %v5030_v5  ;;  %4524 = vmatprep.subr.mxu0 %v309_v1  ;;  %v7017_v5 = vld [vmem:[#allocation41_spill] sm:$0xff] }
  0xcd   : > { %4368 = vmatmul.mubr.msk.f32.gmra.mxu1 %vm442_vm1, %v5270_v31  ;;  %4525 = vmatpush3.msra.mxu0 %v309_v1 }
  0xce   : > { %4370 = vmatprep.mubr.msk.f32.mxu1 %vm442_vm1, %v5281_v53 }
  0xcf   : > { %4427 = vmatmul.mubr.msk.f32.gmra.mxu0 %vm442_vm1, %v5033_v24  ;;  %v7016_v24 = vld [vmem:[#allocation40_spill] sm:$0xff] }
  0xd0   : > { %4429 = vmatprep.mubr.msk.f32.mxu0 %vm442_vm1, %v5087_v48 }
  0xd1   : > { %4371 = vmatmul.mubr.msk.f32.gmra.mxu1 %vm442_vm1, %v7014_v32 }
  0xd2   : > { %4373 = vmatprep.mubr.msk.f32.mxu1 %vm442_vm1, %v5300_v52 }
  0xd3   : > { %4430 = vmatmul.mubr.msk.f32.gmra.mxu0 %vm442_vm1, %v5090_v55  ;;  %v7019_v55 = vld [vmem:[#allocation43_spill] sm:$0xff] }
  0xd4   : > { %4432 = vmatprep.mubr.msk.f32.mxu0 %vm442_vm1, %v4803_v8 }
  0xd5   : > { %4374 = vmatmul.mubr.msk.f32.gmra.mxu1 %vm442_vm1, %v7015_v33 }
  0xd6   : > { %4376 = vmatprep.mubr.msk.f32.mxu1 %vm442_vm1, %v5317_v60 }
  0xd7   : > { %4433 = vmatmul.mubr.msk.f32.gmra.mxu0 %vm442_vm1, %v4808_v11 }
  0xd8   : > { %4435 = vmatprep.mubr.msk.f32.mxu0 %vm442_vm1, %v4829_v22  ;;  %v7018_v22 = vld [vmem:[#allocation42_spill] sm:$0xff] }
  0xd9   : > { %4377 = vmatmul.mubr.msk.f32.gmra.mxu1 %vm442_vm1, %v7016_v24 }
  0xda   : > { %4379 = vmatprep.mubr.msk.f32.mxu1 %vm442_vm1, %v5334_v3 }
  0xdb   : > { %4436 = vmatmul.mubr.msk.f32.gmra.mxu0 %vm442_vm1, %v4832_v23 }
  0xdc   : > { %4438 = vmatprep.mubr.msk.f32.mxu0 %vm442_vm1, %v4866_v37 }
  0xdd   : > { %4380 = vmatmul.mubr.msk.f32.gmra.mxu1 %vm442_vm1, %v7017_v5 }
  0xde   : > { %4382 = vmatprep.mubr.msk.f32.mxu1 %vm442_vm1, %v5351_v7 }
  0xdf   : > { %v5736_v8 = vpop.f32.mrf.mxu0  ;;  %4439 = vmatmul.mubr.msk.f32.gmra.mxu0 %vm442_vm1, %v4876_v41 }
  0xe0   : > { %v5740_v11 = vpop.f32.mrf.mxu1  ;;  %4441 = vmatprep.mubr.msk.f32.mxu0 %vm442_vm1, %v4918_v57 }
  0xe1   : > { %4383 = vmatmul.mubr.msk.f32.gmra.mxu1 %vm442_vm1, %v7018_v22  ;;  %v5746_v23 = vpop.f32.mrf.mxu0 }
  0xe2   : > { %4385 = vmatprep.mubr.msk.f32.mxu1 %vm442_vm1, %v5368_v29  ;;  %v5750_v37 = vpop.f32.mrf.mxu1 }
  0xe3   : > { %v5752_v48 = vpop.f32.mrf.mxu0  ;;  %4442 = vmatmul.mubr.msk.f32.gmra.mxu0 %vm442_vm1, %v4921_v58 }
  0xe4   : > { %v5756_v41 = vpop.f32.mrf.mxu1  ;;  %4444 = vmatprep.mubr.msk.f32.mxu0 %vm442_vm1, %v4953_v9 }
  0xe5   : > { %4386 = vmatmul.mubr.msk.f32.gmra.mxu1 %vm442_vm1, %v7019_v55  ;;  %v5762_v57 = vpop.f32.mrf.mxu0 }
  0xe6   : > { %4388 = vmatprep.mubr.msk.f32.mxu1 %vm442_vm1, %v7020_v45  ;;  %v5766_v44 = vpop.f32.mrf.mxu1 }
  0xe7   : > { %v5768_v15 = vpop.f32.mrf.mxu0  ;;  %4445 = vmatmul.mubr.msk.f32.gmra.mxu0 %vm442_vm1, %v4956_v10 }
  0xe8   : > { %v5772_v58 = vpop.f32.mrf.mxu1  ;;  %4447 = vmatprep.mubr.msk.f32.mxu0 %vm442_vm1, %v4991_v34 }
  0xe9   : > { %4389 = vmatmul.mubr.msk.f32.gmra.mxu1 %vm442_vm1, %v7021_v6  ;;  %v5778_v9 = vpop.f32.mrf.mxu0 }
  0xea   : > { %4391 = vmatprep.mubr.msk.f32.mxu1 %vm442_vm1, %v7022_v20  ;;  %v5782_v18 = vpop.f32.mrf.mxu1 }
  0xeb   : > { %v5784_v12 = vpop.f32.mrf.mxu0  ;;  %4448 = vmatmul.mubr.msk.f32.gmra.mxu0 %vm442_vm1, %v4994_v39 }
  0xec   : > { %4450 = vmatprep.mubr.msk.f32.mxu0 %vm442_vm1, %v5041_v26 }
  0xed   : > { %v5788_v10 = vpop.f32.mrf.mxu1  ;;  %4392 = vmatmul.mubr.msk.f32.gmra.mxu1 %vm442_vm1, %v7023_v35  ;;  %v5794_v34 = vpop.f32.mrf.mxu0 }
  0xee   : > { %4394 = vmatprep.mubr.msk.f32.mxu1 %vm442_vm1, %v5419_v54 }
  0xef   : > { %v5798_v36 = vpop.f32.mrf.mxu1  ;;  %v5800_v50 = vpop.f32.mrf.mxu0  ;;  %4451 = vmatmul.mubr.msk.f32.gmra.mxu0 %vm442_vm1, %v6985_v4  ;;  %v1954_v4 = vrot.slane %v5606_v0, 2 }
  0xf0   : > { %4453 = vmatprep.mubr.msk.f32.mxu0 %vm442_vm1, %v5096_v2 }
  0xf1   : > { %v5804_v39 = vpop.f32.mrf.mxu1  ;;  %4395 = vmatmul.mubr.msk.f32.gmra.mxu1 %vm442_vm1, %v5430_v62  ;;  %v5810_v26 = vpop.f32.mrf.mxu0 }
  0xf2   : > { %7024 = vst [vmem:[#allocation9_spill] sm:$0xff] %v5804_v39  ;;  %4397 = vmatprep.mubr.msk.f32.mxu1 %vm442_vm1, %v5436_v28  ;;  %v5852_v39 = vld [vmem:[%s4788_s17 + $0x1a0] sm:$0xff] }
  0xf3   : > { %v5815_v1 = vpop.f32.mrf.mxu1  ;;  %v5818_v63 = vpop.f32.mrf.mxu0  ;;  %4454 = vmatmul.mubr.msk.f32.gmra.mxu0 %vm442_vm1, %v6986_v21  ;;  %v5839_v21 = vsel %vm1021_vm2, %v1953_v51, %v1954_v4 }
  0xf4   : > { %7025 = vst [vmem:[#allocation11_spill] sm:$0xff] %v5815_v1  ;;  %4456 = vmatprep.mubr.msk.f32.mxu0 %vm442_vm1, %v5603_v38  ;;  %v1956_v1 = vrot.slane %v5619_v40, 2  ;;  %7028 = vst [vmem:[#allocation17_spill] sm:$0xff] %v5839_v21 }
  0xf5   : > { %v5822_v61 = vpop.f32.mrf.mxu1  ;;  %4398 = vmatmul.mubr.msk.f32.gmra.mxu1 %vm442_vm1, %v5447_v27  ;;  %v5828_v2 = vpop.f32.mrf.mxu0 }
  0xf6   : > { %7026 = vst [vmem:[#allocation13_spill] sm:$0xff] %v5822_v61  ;;  %4400 = vmatprep.mubr.msk.f32.mxu1 %vm442_vm1, %v5453_v16  ;;  %v5859_v51 = vsel %vm1021_vm2, %v1954_v4, %v1956_v1 }
  0xf7   : > { %v5836_v25 = vpop.f32.mrf.mxu1  ;;  %v5841_v61 = vpop.f32.mrf.mxu0  ;;  %4457 = vmatmul.mubr.msk.f32.gmra.mxu0 %vm442_vm1, %v5606_v0  ;;  %7030 = vst [vmem:[#allocation37_spill] sm:$0xff] %v5859_v51 }
  0xf8   : > { %7027 = vst [vmem:[#allocation15_spill] sm:$0xff] %v5836_v25  ;;  %4459 = vmatprep.mubr.msk.f32.mxu0 %vm442_vm1, %v5833_v14 }
  0xf9   : > { %v5845_v38 = vpop.f32.mrf.mxu1  ;;  %4401 = vmatmul.mubr.msk.f32.gmra.mxu1 %vm442_vm1, %v5462_v13  ;;  %v5854_v40 = vpop.f32.mrf.mxu0 }
  0xfa   : > { %7029 = vst [vmem:[#allocation22_spill] sm:$0xff] %v5845_v38  ;;  %4403 = vmatprep.mubr.msk.f32.mxu1 %vm442_vm1, %v5839_v21 }
  0xfb   : > { %v5861_v25 = vpop.f32.mrf.mxu1  ;;  %v5863_v0 = vpop.f32.mrf.mxu0  ;;  %4460 = vmatmul.mubr.msk.f32.gmra.mxu0 %vm442_vm1, %v5852_v39 }
  0xfc   : > { %7031 = vst [vmem:[#allocation38_spill] sm:$0xff] %v5861_v25  ;;  %4526 = vmatprep.mubr.msk.f32.mxu0 %vm442_vm1, %v5203_v46 }
  0xfd   : > { %v5867_v38 = vpop.f32.mrf.mxu1  ;;  %4404 = vmatmul.mubr.msk.f32.gmra.mxu1 %vm442_vm1, %v5859_v51  ;;  %v5873_v13 = vpop.f32.mrf.mxu0 }
  0xfe   : > { %7032 = vst [vmem:[#allocation39_spill] sm:$0xff] %v5867_v38  ;;  %4470 = vmatprep.mubr.msk.f32.mxu1 %vm442_vm1, %v6990_v30 }
  0xff   : > { %v5877_v1 = vpop.f32.mrf.mxu1  ;;  %v4192_v4 = vpop.f32.mrf.mxu0  ;;  %4527 = vmatmul.mubr.msk.f32.vlgmr.msra.gmra.mxu0 %vm442_vm1, %v5222_v43 }
 0x100   : > { %7033 = vst [vmem:[#allocation40_spill] sm:$0xff] %v5877_v1  ;;  %4529 = vmatprep.mubr.msk.f32.mxu0 %vm442_vm1, %v5228_v56 }
 0x101   : > { %v4136_v25 = vpop.f32.mrf.mxu1  ;;  %4471 = vmatmul.mubr.msk.f32.vlgmr.msra.gmra.mxu1 %vm442_vm1, %v6991_v47  ;;  %v1232_v38 = vpop.f32.mrf.mxu0 }
 0x102   : > { %v868_v46 = vadd.f32 %v4136_v25, %v5736_v8  ;;  %4473 = vmatprep.mubr.msk.f32.mxu1 %vm442_vm1, %v6992_v19  ;;  %v7034_v19 = vld [vmem:[#allocation19_spill] sm:$0xff] }
 0x103   : > { %v862_v30 = vpop.f32.mrf.mxu1  ;;  %v4195_v21 = vpop.f32.mrf.mxu0  ;;  %4530 = vmatmul.mubr.msk.f32.gmra.mxu0 %vm442_vm1, %v5245_v42 }
 0x104   : > { %v5888_v51 = vadd.f32 %v4192_v4, %v868_v46  ;;  %v863_v1 = vadd.f32 %v862_v30, %v5746_v23  ;;  %4532 = vmatprep.mubr.msk.f32.mxu0 %vm442_vm1, %v7013_v59  ;;  %v7036_v30 = vld [vmem:[#allocation27_spill] sm:$0xff] }
 0x105   : > { %v4139_v43 = vpop.f32.mrf.mxu1  ;;  %4474 = vmatmul.mubr.msk.f32.gmra.mxu1 %vm442_vm1, %v6993_v49  ;;  %v1242_v47 = vpop.f32.mrf.mxu0 }
 0x106   : > { %v5897_v25 = vadd.f32 %v1232_v38, %v863_v1  ;;  %v878_v56 = vadd.f32 %v4139_v43, %v5752_v48  ;;  %4476 = vmatprep.mubr.msk.f32.mxu1 %vm442_vm1, %v7034_v19 }
 0x107   : > { %v872_v8 = vpop.f32.mrf.mxu1  ;;  %v4198_v4 = vpop.f32.mrf.mxu0  ;;  %4533 = vmatmul.mubr.msk.f32.gmra.mxu0 %vm442_vm1, %v5270_v31 }
 0x108   : > { %v5902_v23 = vadd.f32 %v4195_v21, %v878_v56  ;;  %v873_v42 = vadd.f32 %v872_v8, %v5762_v57  ;;  %4535 = vmatprep.mubr.msk.f32.mxu0 %vm442_vm1, %v5281_v53  ;;  %v7035_v21 = vld [vmem:[#allocation24_spill] sm:$0xff]  ;;  %v7037_v56 = vld [vmem:[#allocation29_spill] sm:$0xff] }
 0x109   : > { %v4142_v49 = vpop.f32.mrf.mxu1  ;;  %4477 = vmatmul.mubr.msk.f32.gmra.mxu1 %vm442_vm1, %v6995_v17  ;;  %v1252_v38 = vpop.f32.mrf.mxu0 }
 0x10a   : > { %v5911_v59 = vadd.f32 %v1242_v47, %v873_v42  ;;  %v888_v48 = vadd.f32 %v4142_v49, %v5768_v15  ;;  %4479 = vmatprep.mubr.msk.f32.mxu1 %vm442_vm1, %v7035_v21  ;;  %v7038_v42 = vld [vmem:[#allocation31_spill] sm:$0xff]  ;;  %v7039_v49 = vld [vmem:[#allocation33_spill] sm:$0xff] }
 0x10b   : > { %v882_v57 = vpop.f32.mrf.mxu1  ;;  %v4201_v46 = vpop.f32.mrf.mxu0  ;;  %4536 = vmatmul.mubr.msk.f32.gmra.mxu0 %vm442_vm1, %v7014_v32 }
 0x10c   : > { %v5916_v1 = vadd.f32 %v4198_v4, %v888_v48  ;;  %v883_v31 = vadd.f32 %v882_v57, %v5778_v9  ;;  %4538 = vmatprep.mubr.msk.f32.mxu0 %vm442_vm1, %v5300_v52  ;;  %v7040_v57 = vld [vmem:[#allocation35_spill] sm:$0xff] }
 0x10d   : > { %v4145_v17 = vpop.f32.mrf.mxu1  ;;  %4480 = vmatmul.mubr.msk.f32.gmra.mxu1 %vm442_vm1, %v7036_v30  ;;  %v1262_v43 = vpop.f32.mrf.mxu0 }
 0x10e   : > { %v5925_v53 = vadd.f32 %v1252_v38, %v883_v31  ;;  %v898_v15 = vadd.f32 %v4145_v17, %v5784_v12  ;;  %4482 = vmatprep.mubr.msk.f32.mxu1 %vm442_vm1, %v7037_v56 }
 0x10f   : > { %v892_v9 = vpop.f32.mrf.mxu1  ;;  %v4204_v19 = vpop.f32.mrf.mxu0  ;;  %4539 = vmatmul.mubr.msk.f32.gmra.mxu0 %vm442_vm1, %v7015_v33 }
 0x110   : > { %v5930_v47 = vadd.f32 %v4201_v46, %v898_v15  ;;  %v893_v32 = vadd.f32 %v892_v9, %v5794_v34  ;;  %4541 = vmatprep.mubr.msk.f32.mxu0 %vm442_vm1, %v5317_v60  ;;  %v7041_v46 = vld [vmem:[#allocation5_spill] sm:$0xff]  ;;  %v7043_v9 = vld [vmem:[#allocation8_spill] sm:$0xff] }
 0x111   : > { %v4148_v8 = vpop.f32.mrf.mxu1  ;;  %4483 = vmatmul.mubr.msk.f32.gmra.mxu1 %vm442_vm1, %v7038_v42  ;;  %v1272_v4 = vpop.f32.mrf.mxu0  ;;  %v7044_v42 = vld [vmem:[#allocation10_spill] sm:$0xff] }
 0x112   : > { %v5939_v52 = vadd.f32 %v1262_v43, %v893_v32  ;;  %v908_v12 = vadd.f32 %v4148_v8, %v5800_v50  ;;  %4485 = vmatprep.mubr.msk.f32.mxu1 %vm442_vm1, %v7039_v49  ;;  %v7042_v43 = vld [vmem:[#allocation6_spill] sm:$0xff] }
 0x113   : > { %v902_v34 = vpop.f32.mrf.mxu1  ;;  %v4207_v38 = vpop.f32.mrf.mxu0  ;;  %4542 = vmatmul.mubr.msk.f32.gmra.mxu0 %vm442_vm1, %v7016_v24 }
 0x114   : > { %v5944_v48 = vadd.f32 %v4204_v19, %v908_v12  ;;  %v903_v33 = vadd.f32 %v902_v34, %v5810_v26  ;;  %4544 = vmatprep.mubr.msk.f32.mxu0 %vm442_vm1, %v5334_v3 }
 0x115   : > { %v4151_v21 = vpop.f32.mrf.mxu1  ;;  %4486 = vmatmul.mubr.msk.f32.gmra.mxu1 %vm442_vm1, %v7040_v57  ;;  %v1282_v31 = vpop.f32.mrf.mxu0  ;;  %v7047_v57 = vld [vmem:[#allocation16_spill] sm:$0xff] }
 0x116   : > { %v5953_v60 = vadd.f32 %v1272_v4, %v903_v33  ;;  %v918_v50 = vadd.f32 %v4151_v21, %v5818_v63  ;;  %4488 = vmatprep.mubr.msk.f32.mxu1 %vm442_vm1, %v7041_v46  ;;  %v7045_v4 = vld [vmem:[#allocation12_spill] sm:$0xff] }
 0x117   : > { %v912_v26 = vpop.f32.mrf.mxu1  ;;  %v4210_v30 = vpop.f32.mrf.mxu0  ;;  %4545 = vmatmul.mubr.msk.f32.gmra.mxu0 %vm442_vm1, %v7017_v5 }
 0x118   : > { %v5958_v17 = vadd.f32 %v4207_v38, %v918_v50  ;;  %v913_v24 = vadd.f32 %v912_v26, %v5828_v2  ;;  %4547 = vmatprep.mubr.msk.f32.mxu0 %vm442_vm1, %v5351_v7  ;;  %v7046_v38 = vld [vmem:[#allocation14_spill] sm:$0xff] }
 0x119   : > { %v4154_v15 = vpop.f32.mrf.mxu1  ;;  %4489 = vmatmul.mubr.msk.f32.gmra.mxu1 %vm442_vm1, %v7042_v43  ;;  %v1292_v56 = vpop.f32.mrf.mxu0  ;;  %v7048_v26 = vld [vmem:[#allocation18_spill] sm:$0xff] }
 0x11a   : > { %v5967_v63 = vadd.f32 %v1282_v31, %v913_v24  ;;  %v928_v3 = vadd.f32 %v4154_v15, %v5841_v61  ;;  %4491 = vmatprep.mubr.msk.f32.mxu1 %vm442_vm1, %v7043_v9 }
 0x11b   : > { %v922_v2 = vpop.f32.mrf.mxu1  ;;  %v4213_v19 = vpop.f32.mrf.mxu0  ;;  %4548 = vmatmul.mubr.msk.f32.gmra.mxu0 %vm442_vm1, %v7018_v22 }
 0x11c   : > { %v5972_v32 = vadd.f32 %v4210_v30, %v928_v3  ;;  %v923_v5 = vadd.f32 %v922_v2, %v5854_v40  ;;  %4550 = vmatprep.mubr.msk.f32.mxu0 %vm442_vm1, %v5368_v29  ;;  %v7049_v30 = vld [vmem:[#allocation20_spill] sm:$0xff]  ;;  %v7051_v2 = vld [vmem:[#allocation25_spill] sm:$0xff] }
 0x11d   : > { %v4157_v8 = vpop.f32.mrf.mxu1  ;;  %4492 = vmatmul.mubr.msk.f32.gmra.mxu1 %vm442_vm1, %v7044_v42  ;;  %v1302_v12 = vpop.f32.mrf.mxu0  ;;  %v7052_v42 = vld [vmem:[#allocation28_spill] sm:$0xff] }
 0x11e   : > { %v5981_v7 = vadd.f32 %v1292_v56, %v923_v5  ;;  %v938_v61 = vadd.f32 %v4157_v8, %v5863_v0  ;;  %4494 = vmatprep.mubr.msk.f32.mxu1 %vm442_vm1, %v7045_v4  ;;  %v7050_v56 = vld [vmem:[#allocation23_spill] sm:$0xff] }
 0x11f   : > { %v932_v40 = vpop.f32.mrf.mxu1  ;;  %v4216_v34 = vpop.f32.mrf.mxu0  ;;  %4551 = vmatmul.mubr.msk.f32.gmra.mxu0 %vm442_vm1, %v7019_v55 }
 0x120   : > { %v5986_v49 = vadd.f32 %v4213_v19, %v938_v61  ;;  %v933_v22 = vadd.f32 %v932_v40, %v5873_v13  ;;  %4553 = vmatprep.mubr.msk.f32.mxu0 %vm442_vm1, %v7020_v45 }
 0x121   : > { %v4160_v33 = vpop.f32.mrf.mxu1  ;;  %4495 = vmatmul.mubr.msk.f32.gmra.mxu1 %vm442_vm1, %v7046_v38  ;;  %v1312_v21 = vpop.f32.mrf.mxu0  ;;  %v7055_v38 = vld [vmem:[#allocation9_spill] sm:$0xff] }
 0x122   : > { %v5995_v29 = vadd.f32 %v1302_v12, %v933_v22  ;;  %v948_v0 = vadd.f32 %v4160_v33, %v5740_v11  ;;  %4497 = vmatprep.mubr.msk.f32.mxu1 %vm442_vm1, %v7047_v57  ;;  %v7053_v12 = vld [vmem:[#allocation30_spill] sm:$0xff]  ;;  %v2483_v57 = vrot.slane %v5833_v14, 1 }
 0x123   : > { %v942_v13 = vpop.f32.mrf.mxu1  ;;  %v4219_v31 = vpop.f32.mrf.mxu0  ;;  %4554 = vmatmul.mubr.msk.f32.gmra.mxu0 %vm442_vm1, %v7021_v6 }
 0x124   : > { %v6000_v50 = vadd.f32 %v4216_v34, %v948_v0  ;;  %v943_v55 = vadd.f32 %v942_v13, %v5750_v37  ;;  %4556 = vmatprep.mubr.msk.f32.mxu0 %vm442_vm1, %v7022_v20  ;;  %v2750_v34 = vrot.slane %v5852_v39, 2  ;;  %v2484_v13 = vrot.slane %v5852_v39, 1  ;;  %v7061_v39 = vld [vmem:[#allocation13_spill] sm:$0xff] }
 0x125   : > { %v4163_v46 = vpop.f32.mrf.mxu1  ;;  %4498 = vmatmul.mubr.msk.f32.gmra.mxu1 %vm442_vm1, %v7048_v26  ;;  %v1322_v24 = vpop.f32.mrf.mxu0 }
 0x126   : > { %v6009_v11 = vadd.f32 %v1312_v21, %v943_v55  ;;  %v958_v45 = vadd.f32 %v4163_v46, %v5756_v41  ;;  %4500 = vmatprep.mubr.msk.f32.mxu1 %vm442_vm1, %v7049_v30  ;;  %v7056_v21 = vld [vmem:[#allocation34_spill] sm:$0xff]  ;;  %v7059_v30 = vld [vmem:[#allocation36_spill] sm:$0xff] }
 0x127   : > { %v952_v37 = vpop.f32.mrf.mxu1  ;;  %v4222_v43 = vpop.f32.mrf.mxu0  ;;  %4557 = vmatmul.mubr.msk.f32.gmra.mxu0 %vm442_vm1, %v7023_v35 }
 0x128   : > { %v6014_v15 = vadd.f32 %v4219_v31, %v958_v45  ;;  %v953_v6 = vadd.f32 %v952_v37, %v5766_v44  ;;  %4559 = vmatprep.mubr.msk.f32.mxu0 %vm442_vm1, %v5419_v54  ;;  %v7058_v45 = vld [vmem:[#allocation21_spill] sm:$0xff] }
 0x129   : > { %v4166_v3 = vpop.f32.mrf.mxu1  ;;  %4501 = vmatmul.mubr.msk.f32.gmra.mxu1 %vm442_vm1, %v7050_v56  ;;  %v1332_v9 = vpop.f32.mrf.mxu0  ;;  %v7060_v37 = vld [vmem:[#allocation17_spill] sm:$0xff]  ;;  %v7062_v56 = vld [vmem:[#allocation26_spill] sm:$0xff] }
 0x12a   : > { %v6023_v41 = vadd.f32 %v1322_v24, %v953_v6  ;;  %v968_v20 = vadd.f32 %v4166_v3, %v5772_v58  ;;  %4503 = vmatprep.mubr.msk.f32.mxu1 %vm442_vm1, %v7051_v2 }
 0x12b   : > { %v962_v44 = vpop.f32.mrf.mxu1  ;;  %v4225_v19 = vpop.f32.mrf.mxu0  ;;  %4560 = vmatmul.mubr.msk.f32.gmra.mxu0 %vm442_vm1, %v5430_v62 }
 0x12c   : > { %v6028_v5 = vadd.f32 %v4222_v43, %v968_v20  ;;  %v963_v35 = vadd.f32 %v962_v44, %v5782_v18  ;;  %4562 = vmatprep.mubr.msk.f32.mxu0 %vm442_vm1, %v5436_v28  ;;  %v7054_v28 = vld [vmem:[#allocation32_spill] sm:$0xff]  ;;  %v2485_v44 = vsel %vm361_vm0, %v2483_v57, %v2484_v13 }
 0x12d   : > { %v4169_v8 = vpop.f32.mrf.mxu1  ;;  %4504 = vmatmul.mubr.msk.f32.gmra.mxu1 %vm442_vm1, %v7052_v42  ;;  %v1342_v61 = vpop.f32.mrf.mxu0 }
 0x12e   : > { %v6037_v54 = vadd.f32 %v1332_v9, %v963_v35  ;;  %v978_v58 = vadd.f32 %v4169_v8, %v5788_v10  ;;  %4506 = vmatprep.mubr.msk.f32.mxu1 %vm442_vm1, %v7053_v12  ;;  %v2749_v10 = vrot.slane %v5833_v14, 2  ;;  %v7065_v12 = vld [vmem:[#allocation7_spill] sm:$0xff] }
 0x12f   : > { %v972_v18 = vpop.f32.mrf.mxu1  ;;  %v4228_v40 = vpop.f32.mrf.mxu0  ;;  %4563 = vmatmul.mubr.msk.f32.gmra.mxu0 %vm442_vm1, %v5447_v27  ;;  %v276_v27 = vld [vmem:[%s4788_s17 + $0x1a8] sm:$0x3]  ;;  %s4632_s17 = sshll.u32 %s4690_s30, 4  ;;  %s4633_s17 = int_to_ptr.vmem [resolvable:$false] %s4632_s17 }
 0x130   : > { %v6042_v4 = vadd.f32 %v4225_v19, %v978_v58  ;;  %v973_v62 = vadd.f32 %v972_v18, %v5798_v36  ;;  %4565 = vmatprep.mubr.msk.f32.mxu0 %vm442_vm1, %v5453_v16  ;;  %v7057_v16 = vld [vmem:[#allocation11_spill] sm:$0xff]  ;;  %v2752_v6 = vrot.slane %v276_v27, 2  ;;  %v2751_v20 = vsel %vm1021_vm2, %v2749_v10, %v2750_v34  ;;  %v7064_v58 = vld [vmem:[#allocation37_spill] sm:$0xff]  ;;  %s4634_s6 = scalar_lea.vmem %s4633_s17, 8192  ;;  %p4635_p0 = scmp.lt.s32.totalorder %s6786_s15, %s4633_s17 }
 0x131   : > { %v4172_v22 = vpop.f32.mrf.mxu1  ;;  %4507 = vmatmul.mubr.msk.f32.gmra.mxu1 %vm442_vm1, %v7054_v28  ;;  %v1352_v36 = vpop.f32.mrf.mxu0  ;;  %v2486_v9 = vrot.slane %v276_v27, 1  ;;  %v7063_v19 = vld [vmem:[#allocation15_spill] sm:$0xff]  ;;  %p4636_p1 = scmp.lt.s32.totalorder %s4634_s6, %s4628_s26 }
 0x132   : > { %v6053_v33 = vadd.f32 %v1342_v61, %v973_v62  ;;  %v988_v0 = vadd.f32 %v4172_v22, %v7055_v38  ;;  %4509 = vmatprep.mubr.msk.f32.mxu1 %vm442_vm1, %v7056_v21  ;;  %v2753_v18 = vsel %vm1021_vm2, %v2750_v34, %v2752_v6 }
 0x133   : > { %v982_v55 = vpop.f32.mrf.mxu1  ;;  %v4231_v26 = vpop.f32.mrf.mxu0  ;;  %4566 = vmatmul.mubr.msk.f32.gmra.mxu0 %vm442_vm1, %v7058_v45  ;;  %v2487_v10 = vsel %vm361_vm0, %v2484_v13, %v2486_v9  ;;  %v7069_v13 = vld [vmem:[#allocation40_spill] sm:$0xff]  ;;  %p4637_p2 = por %p4636_p1, %p4635_p0 }
 0x134   : > { %v6061_v31 = vadd.f32 %v4228_v40, %v988_v0  ;;  %v983_v46 = vadd.f32 %v982_v55, %v7057_v16  ;;  %4568 = vmatprep.mubr.msk.f32.mxu0 %vm442_vm1, %v7060_v37  ;;  %v7066_v40 = vld [vmem:[#allocation22_spill] sm:$0xff]  ;;  %v7068_v55 = vld [vmem:[#allocation39_spill] sm:$0xff] }
 0x135   : > { %v4175_v24 = vpop.f32.mrf.mxu1  ;;  %4510 = vmatmul.mubr.msk.f32.gmra.mxu1 %vm442_vm1, %v7059_v30  ;;  %v1362_v3 = vpop.f32.mrf.mxu0  ;;  %p4638_p3 = pnand %p4637_p2, %p4631_p13 }
 0x136   : > { %v6070_v14 = vadd.f32 %v1352_v36, %v983_v46  ;;  %v998_v43 = vadd.f32 %v4175_v24, %v7061_v39  ;;  %4512 = vmatprep.mubr.msk.f32.mxu1 %vm442_vm1, %v7062_v56  ;;  %v7067_v36 = vld [vmem:[#allocation38_spill] sm:$0xff] }
 0x137   : > { %v992_v2 = vpop.f32.mrf.mxu1  ;;  %v4234_v42 = vpop.f32.mrf.mxu0  ;;  %4569 = vmatmul.mubr.msk.f32.gmra.mxu0 %vm442_vm1, %v7064_v58 }
 0x138   : > { %v6077_v35 = vadd.f32 %v4231_v26, %v998_v43  ;;  %v993_v8 = vadd.f32 %v992_v2, %v7063_v19  ;;  %4571 = vmatprep.mubr.msk.f32.mxu0 %vm442_vm1, %v2751_v20 }
 0x139   : > { %v4178_v61 = vpop.f32.mrf.mxu1  ;;  %4513 = vmatmul.mubr.msk.f32.gmra.mxu1 %vm442_vm1, %v7065_v12  ;;  %v1372_v28 = vpop.f32.mrf.mxu0 }
 0x13a   : > { %v6086_v62 = vadd.f32 %v1362_v3, %v993_v8  ;;  %v1008_v22 = vadd.f32 %v4178_v61, %v7066_v40  ;;  %4515 = vmatprep.mubr.msk.f32.mxu1 %vm442_vm1, %v2485_v44 }
 0x13b   : > { %v1002_v38 = vpop.f32.mrf.mxu1  ;;  %v4237_v27 = vpop.f32.mrf.mxu0  ;;  %4572 = vmatmul.mubr.msk.f32.gmra.mxu0 %vm442_vm1, %v2753_v18 }
 0x13c   : > { %v6091_v0 = vadd.f32 %v4234_v42, %v1008_v22  ;;  %v1003_v21 = vadd.f32 %v1002_v38, %v7067_v36 }
 0x13d   : > { %v4181_v57 = vpop.f32.mrf.mxu1  ;;  %4516 = vmatmul.mubr.msk.f32.gmra.mxu1 %vm442_vm1, %v2487_v10  ;;  %v1382_v46 = vpop.f32.mrf.mxu0 }
 0x13e   : > { %v6096_v34 = vadd.f32 %v1372_v28, %v1003_v21  ;;  %v1018_v16 = vadd.f32 %v4181_v57, %v7068_v55 }
 0x13f   : > { %v1012_v26 = vpop.f32.mrf.mxu1  ;;  %v4304_v30 = vpop.f32.mrf.mxu0 }
 0x140   : > { %v6099_v45 = vadd.f32 %v4237_v27, %v1018_v16  ;;  %v1013_v24 = vadd.f32 %v1012_v26, %v7069_v13 }
 0x141   : > { %v4248_v37 = vpop.f32.mrf.mxu1  ;;  %v1762_v43 = vpop.f32.mrf.mxu0 }
 0x142   : > { %v6102_v6 = vadd.f32 %v1382_v46, %v1013_v24  ;;  %v1655_v39 = vadd.f32 %v4248_v37, %v5888_v51 }
 0x143   : > { %v1495_v3 = vpop.f32.mrf.mxu1  ;;  %v4307_v9 = vpop.f32.mrf.mxu0 }
 0x144   : > { %v6105_v56 = vadd.f32 %v4304_v30, %v1655_v39  ;;  %v1654_v20 = vadd.f32 %v1495_v3, %v5897_v25 }
 0x145   : > { %v4251_v2 = vpop.f32.mrf.mxu1  ;;  %v1772_v8 = vpop.f32.mrf.mxu0 }
 0x146   : > { %v6108_v44 = vadd.f32 %v1762_v43, %v1654_v20  ;;  %v1657_v19 = vadd.f32 %v4251_v2, %v5902_v23 }
 0x147   : > { %v1505_v42 = vpop.f32.mrf.mxu1  ;;  %v4310_v12 = vpop.f32.mrf.mxu0 }
 0x148   : > { %v6111_v58 = vadd.f32 %v4307_v9, %v1657_v19  ;;  %v1656_v61 = vadd.f32 %v1505_v42, %v5911_v59 }
 0x149   : > { %v4254_v51 = vpop.f32.mrf.mxu1  ;;  %v1782_v22 = vpop.f32.mrf.mxu0 }
 0x14a   : > { %v6114_v18 = vadd.f32 %v1772_v8, %v1656_v61  ;;  %v1659_v40 = vadd.f32 %v4254_v51, %v5916_v1 }
 0x14b   : > { %v1515_v25 = vpop.f32.mrf.mxu1  ;;  %v4313_v38 = vpop.f32.mrf.mxu0 }
 0x14c   : > { %v6117_v28 = vadd.f32 %v4310_v12, %v1659_v40  ;;  %v1658_v10 = vadd.f32 %v1515_v25, %v5925_v53 }
 0x14d   : > { %v4257_v23 = vpop.f32.mrf.mxu1  ;;  %v1792_v27 = vpop.f32.mrf.mxu0 }
 0x14e   : > { %v6120_v36 = vadd.f32 %v1782_v22, %v1658_v10  ;;  %v1661_v21 = vadd.f32 %v4257_v23, %v5930_v47 }
 0x14f   : > { %v1525_v59 = vpop.f32.mrf.mxu1  ;;  %v4316_v16 = vpop.f32.mrf.mxu0 }
 0x150   : > { %v6123_v57 = vadd.f32 %v4313_v38, %v1661_v21  ;;  %v1660_v55 = vadd.f32 %v1525_v59, %v5939_v52 }
 0x151   : > { %v4260_v1 = vpop.f32.mrf.mxu1  ;;  %v1802_v13 = vpop.f32.mrf.mxu0 }
 0x152   : > { %v6126_v46 = vadd.f32 %v1792_v27, %v1660_v55  ;;  %v1663_v26 = vadd.f32 %v4260_v1, %v5944_v48 }
 0x153   : > { %v1535_v53 = vpop.f32.mrf.mxu1  ;;  %v4319_v37 = vpop.f32.mrf.mxu0 }
 0x154   : > { %v6129_v24 = vadd.f32 %v4316_v16, %v1663_v26  ;;  %v1662_v30 = vadd.f32 %v1535_v53, %v5953_v60 }
 0x155   : > { %v4263_v47 = vpop.f32.mrf.mxu1  ;;  %v1812_v3 = vpop.f32.mrf.mxu0 }
 0x156   : > { %v6132_v39 = vadd.f32 %v1802_v13, %v1662_v30  ;;  %v1665_v43 = vadd.f32 %v4263_v47, %v5958_v17 }
 0x157   : > { %v1545_v52 = vpop.f32.mrf.mxu1  ;;  %v4322_v2 = vpop.f32.mrf.mxu0 }
 0x158   : > { %v6135_v20 = vadd.f32 %v4319_v37, %v1665_v43  ;;  %v1664_v9 = vadd.f32 %v1545_v52, %v5967_v63 }
 0x159   : > { %v4266_v48 = vpop.f32.mrf.mxu1  ;;  %v1822_v42 = vpop.f32.mrf.mxu0 }
 0x15a   : > { %v6138_v19 = vadd.f32 %v1812_v3, %v1664_v9  ;;  %v1667_v8 = vadd.f32 %v4266_v48, %v5972_v32 }
 0x15b   : > { %v1555_v60 = vpop.f32.mrf.mxu1  ;;  %v4325_v51 = vpop.f32.mrf.mxu0 }
 0x15c   : > { %v6141_v61 = vadd.f32 %v4322_v2, %v1667_v8  ;;  %v1666_v12 = vadd.f32 %v1555_v60, %v5981_v7 }
 0x15d   : > { %v4269_v17 = vpop.f32.mrf.mxu1  ;;  %v1832_v25 = vpop.f32.mrf.mxu0 }
 0x15e   : > { %v6144_v40 = vadd.f32 %v1822_v42, %v1666_v12  ;;  %v1669_v22 = vadd.f32 %v4269_v17, %v5986_v49 }
 0x15f   : > { %v1565_v63 = vpop.f32.mrf.mxu1  ;;  %v4328_v23 = vpop.f32.mrf.mxu0 }
 0x160   : > { %v6147_v10 = vadd.f32 %v4325_v51, %v1669_v22  ;;  %v1668_v38 = vadd.f32 %v1565_v63, %v5995_v29 }
 0x161   : > { %v4272_v32 = vpop.f32.mrf.mxu1  ;;  %v1842_v59 = vpop.f32.mrf.mxu0 }
 0x162   : > { %v6150_v21 = vadd.f32 %v1832_v25, %v1668_v38  ;;  %v1671_v27 = vadd.f32 %v4272_v32, %v6000_v50 }
 0x163   : > { %v1575_v7 = vpop.f32.mrf.mxu1  ;;  %v4331_v1 = vpop.f32.mrf.mxu0 }
 0x164   : > { %v6153_v55 = vadd.f32 %v4328_v23, %v1671_v27  ;;  %v1670_v16 = vadd.f32 %v1575_v7, %v6009_v11 }
 0x165   : > { %v4275_v49 = vpop.f32.mrf.mxu1  ;;  %v1852_v53 = vpop.f32.mrf.mxu0 }
 0x166   : > { %v6156_v26 = vadd.f32 %v1842_v59, %v1670_v16  ;;  %v1673_v13 = vadd.f32 %v4275_v49, %v6014_v15 }
 0x167   : > { %v1585_v29 = vpop.f32.mrf.mxu1  ;;  %v4334_v47 = vpop.f32.mrf.mxu0 }
 0x168   : > { %v6159_v30 = vadd.f32 %v4331_v1, %v1673_v13  ;;  %v1672_v37 = vadd.f32 %v1585_v29, %v6023_v41 }
 0x169   : > { %v4278_v50 = vpop.f32.mrf.mxu1  ;;  %v1862_v52 = vpop.f32.mrf.mxu0 }
 0x16a   : > { %v6162_v43 = vadd.f32 %v1852_v53, %v1672_v37  ;;  %v1675_v3 = vadd.f32 %v4278_v50, %v6028_v5 }
 0x16b   : > { %v1595_v11 = vpop.f32.mrf.mxu1  ;;  %v4337_v48 = vpop.f32.mrf.mxu0 }
 0x16c   : > { %v6165_v9 = vadd.f32 %v4334_v47, %v1675_v3  ;;  %v1674_v2 = vadd.f32 %v1595_v11, %v6037_v54 }
 0x16d   : > { %v4281_v15 = vpop.f32.mrf.mxu1  ;;  %v1872_v60 = vpop.f32.mrf.mxu0 }
 0x16e   : > { %v6168_v8 = vadd.f32 %v1862_v52, %v1674_v2  ;;  %v1677_v42 = vadd.f32 %v4281_v15, %v6042_v4 }
 0x16f   : > { %v1605_v41 = vpop.f32.mrf.mxu1  ;;  %v4340_v17 = vpop.f32.mrf.mxu0 }
 0x170   : > { %v6171_v12 = vadd.f32 %v4337_v48, %v1677_v42  ;;  %v1676_v51 = vadd.f32 %v1605_v41, %v6053_v33 }
 0x171   : > { %v4284_v5 = vpop.f32.mrf.mxu1  ;;  %v1882_v63 = vpop.f32.mrf.mxu0 }
 0x172   : > { %v6174_v22 = vadd.f32 %v1872_v60, %v1676_v51  ;;  %v1679_v25 = vadd.f32 %v4284_v5, %v6061_v31 }
 0x173   : > { %v1615_v54 = vpop.f32.mrf.mxu1  ;;  %v4343_v32 = vpop.f32.mrf.mxu0 }
 0x174   : > { %v6177_v38 = vadd.f32 %v4340_v17, %v1679_v25  ;;  %v1678_v23 = vadd.f32 %v1615_v54, %v6070_v14 }
 0x175   : > { %v4287_v4 = vpop.f32.mrf.mxu1  ;;  %v1892_v7 = vpop.f32.mrf.mxu0 }
 0x176   : > { %v6180_v27 = vadd.f32 %v1882_v63, %v1678_v23  ;;  %v1681_v59 = vadd.f32 %v4287_v4, %v6077_v35 }
 0x177   : > { %v1625_v33 = vpop.f32.mrf.mxu1  ;;  %v4346_v49 = vpop.f32.mrf.mxu0 }
 0x178   : > { %v6183_v16 = vadd.f32 %v4343_v32, %v1681_v59  ;;  %v1680_v1 = vadd.f32 %v1625_v33, %v6086_v62 }
 0x179   : > { %v4290_v31 = vpop.f32.mrf.mxu1  ;;  %v1902_v29 = vpop.f32.mrf.mxu0 }
 0x17a   : > { %v6186_v13 = vadd.f32 %v1892_v7, %v1680_v1  ;;  %v1683_v53 = vadd.f32 %v4290_v31, %v6091_v0 }
 0x17b   : > { %v1635_v14 = vpop.f32.mrf.mxu1  ;;  %v4349_v50 = vpop.f32.mrf.mxu0 }
 0x17c   : > { %v6189_v37 = vadd.f32 %v4346_v49, %v1683_v53  ;;  %v1682_v47 = vadd.f32 %v1635_v14, %v6096_v34 }
 0x17d   : > { %v4293_v35 = vpop.f32.mrf.mxu1  ;;  %v1912_v11 = vpop.f32.mrf.mxu0 }
 0x17e   : > { %v6192_v3 = vadd.f32 %v1902_v29, %v1682_v47  ;;  %v1685_v52 = vadd.f32 %v4293_v35, %v6099_v45 }
 0x17f   : > { %v1645_v62 = vpop.f32.mrf.mxu1  ;;  %v4416_v15 = vpop.f32.mrf.mxu0 }
 0x180   : > { %v6195_v2 = vadd.f32 %v4349_v50, %v1685_v52  ;;  %v1684_v48 = vadd.f32 %v1645_v62, %v6102_v6 }
 0x181   : > { %v4360_v0 = vpop.f32.mrf.mxu1  ;;  %v6201_v41 = vpop.f32.mrf.mxu0 }
 0x182   : > { %v6198_v42 = vadd.f32 %v1912_v11, %v1684_v48  ;;  %v2188_v60 = vadd.f32 %v4360_v0, %v6105_v56 }
 0x183   : > { %v6203_v34 = vpop.f32.mrf.mxu1  ;;  %v4419_v17 = vpop.f32.mrf.mxu0 }
 0x184   : > { %v6205_v51 = vadd.f32 %v4416_v15, %v2188_v60 }
 0x185   : > { %v4363_v45 = vpop.f32.mrf.mxu1  ;;  %v6208_v25 = vpop.f32.mrf.mxu0 }
 0x186   : > { %v2190_v5 = vadd.f32 %v4363_v45, %v6111_v58 }
 0x187   : > { %v6210_v63 = vpop.f32.mrf.mxu1  ;;  %v4422_v54 = vpop.f32.mrf.mxu0 }
 0x188   : > { %v6212_v6 = vadd.f32 %v4419_v17, %v2190_v5 }
 0x189   : > { %v4366_v23 = vpop.f32.mrf.mxu1  ;;  %v6215_v32 = vpop.f32.mrf.mxu0 }
 0x18a   : > { %v2192_v56 = vadd.f32 %v4366_v23, %v6117_v28 }
 0x18b   : > { %v6217_v4 = vpop.f32.mrf.mxu1  ;;  %v4425_v7 = vpop.f32.mrf.mxu0 }
 0x18c   : > { %v6219_v59 = vadd.f32 %v4422_v54, %v2192_v56 }
 0x18d   : > { %v4369_v33 = vpop.f32.mrf.mxu1  ;;  %v6222_v1 = vpop.f32.mrf.mxu0 }
 0x18e   : > { %v2194_v58 = vadd.f32 %v4369_v33, %v6123_v57 }
 0x18f   : > { %v6224_v49 = vpop.f32.mrf.mxu1  ;;  %v4428_v53 = vpop.f32.mrf.mxu0 }
 0x190   : > { %v6226_v31 = vadd.f32 %v4425_v7, %v2194_v58 }
 0x191   : > { %v4372_v29 = vpop.f32.mrf.mxu1  ;;  %v6229_v14 = vpop.f32.mrf.mxu0 }
 0x192   : > { %v2196_v28 = vadd.f32 %v4372_v29, %v6129_v24 }
 0x193   : > { %v6231_v47 = vpop.f32.mrf.mxu1  ;;  %v4431_v35 = vpop.f32.mrf.mxu0 }
 0x194   : > { %v6233_v50 = vadd.f32 %v4428_v53, %v2196_v28 }
 0x195   : > { %v4375_v52 = vpop.f32.mrf.mxu1  ;;  %v6236_v11 = vpop.f32.mrf.mxu0 }
 0x196   : > { %7070 = vst [vmem:[#allocation41_spill] sm:$0xff] %v6233_v50  ;;  %v2198_v57 = vadd.f32 %v4375_v52, %v6135_v20 }
 0x197   : > { %v6238_v62 = vpop.f32.mrf.mxu1  ;;  %v4434_v15 = vpop.f32.mrf.mxu0 }
 0x198   : > { %v6240_v48 = vadd.f32 %v4431_v35, %v2198_v57 }
 0x199   : > { %v4378_v0 = vpop.f32.mrf.mxu1  ;;  %v6243_v60 = vpop.f32.mrf.mxu0 }
 0x19a   : > { %7071 = vst [vmem:[#allocation42_spill] sm:$0xff] %v6240_v48  ;;  %v2200_v24 = vadd.f32 %v4378_v0, %v6141_v61 }
 0x19b   : > { %v6245_v17 = vpop.f32.mrf.mxu1  ;;  %v4437_v5 = vpop.f32.mrf.mxu0 }
 0x19c   : > { %v6247_v45 = vadd.f32 %v4434_v15, %v2200_v24 }
 0x19d   : > { %v4381_v54 = vpop.f32.mrf.mxu1  ;;  %v6250_v23 = vpop.f32.mrf.mxu0 }
 0x19e   : > { %7072 = vst [vmem:[#allocation43_spill] sm:$0xff] %v6247_v45  ;;  %v2202_v20 = vadd.f32 %v4381_v54, %v6147_v10 }
 0x19f   : > { %v6252_v56 = vpop.f32.mrf.mxu1  ;;  %v4440_v33 = vpop.f32.mrf.mxu0 }
 0x1a0   : > { %v6254_v7 = vadd.f32 %v4437_v5, %v2202_v20 }
 0x1a1   : > { %v4384_v58 = vpop.f32.mrf.mxu1  ;;  %v6257_v53 = vpop.f32.mrf.mxu0 }
 0x1a2   : > { %7073 = vst [vmem:[#allocation44_spill] sm:$0xff] %v6254_v7  ;;  %v2204_v61 = vadd.f32 %v4384_v58, %v6153_v55 }
 0x1a3   : > { %v2108_v29 = vpop.f32.mrf.mxu1  ;;  %v4443_v35 = vpop.f32.mrf.mxu0 }
 0x1a4   : > { %v6259_v28 = vadd.f32 %v4440_v33, %v2204_v61 }
 0x1a5   : > { %v4387_v52 = vpop.f32.mrf.mxu1  ;;  %v6262_v10 = vpop.f32.mrf.mxu0 }
 0x1a6   : > { %7074 = vst [vmem:[#allocation45_spill] sm:$0xff] %v6259_v28  ;;  %v2206_v57 = vadd.f32 %v4387_v52, %v6159_v30 }
 0x1a7   : > { %v2118_v15 = vpop.f32.mrf.mxu1  ;;  %v4446_v24 = vpop.f32.mrf.mxu0 }
 0x1a8   : > { %v6264_v0 = vadd.f32 %v4443_v35, %v2206_v57 }
 0x1a9   : > { %v4390_v5 = vpop.f32.mrf.mxu1  ;;  %v6267_v20 = vpop.f32.mrf.mxu0 }
 0x1aa   : > { %7075 = vst [vmem:[#allocation46_spill] sm:$0xff] %v6264_v0  ;;  %v2208_v54 = vadd.f32 %v4390_v5, %v6165_v9 }
 0x1ab   : > { %v2128_v55 = vpop.f32.mrf.mxu1  ;;  %v4449_v33 = vpop.f32.mrf.mxu0 }
 0x1ac   : > { %v6269_v58 = vadd.f32 %v4446_v24, %v2208_v54 }
 0x1ad   : > { %v4393_v61 = vpop.f32.mrf.mxu1  ;;  %v6272_v7 = vpop.f32.mrf.mxu0 }
 0x1ae   : > { %7076 = vst [vmem:[#allocation47_spill] sm:$0xff] %v6269_v58  ;;  %v2210_v28 = vadd.f32 %v4393_v61, %v6171_v12 }
 0x1af   : > { %v2138_v30 = vpop.f32.mrf.mxu1  ;;  %v4452_v35 = vpop.f32.mrf.mxu0 }
 0x1b0   : > { %v6274_v52 = vadd.f32 %v4449_v33, %v2210_v28 }
 0x1b1   : > { %v4396_v57 = vpop.f32.mrf.mxu1  ;;  %v6277_v45 = vpop.f32.mrf.mxu0 }
 0x1b2   : > { %7077 = vst [vmem:[#allocation19_spill] sm:$0xff] %v6274_v52  ;;  %v2212_v0 = vadd.f32 %v4396_v57, %v6177_v38 }
 0x1b3   : > { %v2148_v9 = vpop.f32.mrf.mxu1  ;;  %v4455_v24 = vpop.f32.mrf.mxu0 }
 0x1b4   : > { %v6279_v5 = vadd.f32 %v4452_v35, %v2212_v0 }
 0x1b5   : > { %v4399_v54 = vpop.f32.mrf.mxu1  ;;  %v6282_v48 = vpop.f32.mrf.mxu0 }
 0x1b6   : > { %7078 = vst [vmem:[#allocation24_spill] sm:$0xff] %v6279_v5  ;;  %v2214_v58 = vadd.f32 %v4399_v54, %v6183_v16  ;;  %v2187_v5 = vadd.f32 %v6203_v34, %v6108_v44  ;;  %v2189_v16 = vadd.f32 %v6210_v63, %v6114_v18  ;;  %v2195_v44 = vadd.f32 %v6231_v47, %v6132_v39  ;;  %v6319_v39 = vld [vmem:[%s6854_s2] ss:$0 sm:$0xff] }
 0x1b7   : > { %v2158_v12 = vpop.f32.mrf.mxu1  ;;  %v4458_v28 = vpop.f32.mrf.mxu0 }
 0x1b8   : > { %v6284_v61 = vadd.f32 %v4455_v24, %v2214_v58  ;;  %v2450_v18 = vadd.f32 %v6201_v41, %v2187_v5  ;;  %v2211_v5 = vadd.f32 %v2148_v9, %v6180_v27 }
 0x1b9   : > { %v4402_v33 = vpop.f32.mrf.mxu1  ;;  %v6287_v50 = vpop.f32.mrf.mxu0 }
 0x1ba   : > { %v2216_v52 = vadd.f32 %v4402_v33, %v6189_v37  ;;  %v2191_v37 = vadd.f32 %v6217_v4, %v6120_v36  ;;  %v2197_v4 = vadd.f32 %v6238_v62, %v6138_v19  ;;  %v6326_v62 = vadd.f32 %v6229_v14, %v2195_v44 }
 0x1bb   : > { %v2168_v38 = vpop.f32.mrf.mxu1  ;;  %v4461_v0 = vpop.f32.mrf.mxu0 }
 0x1bc   : > { %v6289_v57 = vadd.f32 %v4458_v28, %v2216_v52  ;;  %v2193_v52 = vadd.f32 %v6224_v49, %v6126_v46  ;;  %v2454_v36 = vadd.f32 %v6215_v32, %v2191_v37  ;;  %v2199_v46 = vadd.f32 %v6245_v17, %v6144_v40 }
 0x1bd   : > { %v4405_v35 = vpop.f32.mrf.mxu1  ;;  %v6296_v24 = vpop.f32.mrf.mxu0  ;;  %v2201_v49 = vadd.f32 %v6252_v56, %v6150_v21  ;;  %v2205_v40 = vadd.f32 %v2118_v15, %v6162_v43  ;;  %v2207_v21 = vadd.f32 %v2128_v55, %v6168_v8  ;;  %v2209_v17 = vadd.f32 %v2138_v30, %v6174_v22 }
 0x1be   : > { %v2218_v58 = vadd.f32 %v4405_v35, %v6195_v2  ;;  %v2452_v2 = vadd.f32 %v6208_v25, %v2189_v16  ;;  %v2203_v25 = vadd.f32 %v2108_v29, %v6156_v26  ;;  %v6337_v16 = vadd.f32 %v6236_v11, %v2197_v4 }
 0x1bf   : > { %v2178_v54 = vpop.f32.mrf.mxu1  ;;  %v4528_v33 = vpop.f32.mrf.mxu0  ;;  %v6340_v14 = vadd.f32 %v6243_v60, %v2199_v46  ;;  %v6343_v43 = vadd.f32 %v6250_v23, %v2201_v49  ;;  %v2213_v8 = vadd.f32 %v2158_v12, %v6186_v13  ;;  %v2215_v15 = vadd.f32 %v2168_v38, %v6192_v3 }
 0x1c0   : > { %v6302_v28 = vadd.f32 %v4461_v0, %v2218_v58  ;;  %v6347_v27 = vadd.f32 %v6257_v53, %v2203_v25  ;;  %v6354_v30 = vadd.f32 %v6262_v10, %v2205_v40  ;;  %v6357_v60 = vadd.f32 %v6267_v20, %v2207_v21 }
 0x1c1   : > { %v4472_v34 = vpop.f32.mrf.mxu1  ;;  %v2824_v35 = vpop.f32.mrf.mxu0  ;;  %v6362_v53 = vadd.f32 %v6272_v7, %v2209_v17  ;;  %v6365_v3 = vadd.f32 %v6277_v45, %v2211_v5  ;;  %v6373_v20 = vadd.f32 %v6282_v48, %v2213_v8  ;;  %v6379_v45 = vadd.f32 %v6287_v50, %v2215_v15 }
 0x1c2   : > { %v2718_v63 = vadd.f32 %v4472_v34, %v6205_v51  ;;  %v6322_v51 = vadd.f32 %v6222_v1, %v2193_v52 }
 0x1c3   : > { %v2558_v41 = vpop.f32.mrf.mxu1  ;;  %v4531_v19 = vpop.f32.mrf.mxu0 }
 0x1c4   : > { %v2984_v32 = vadd.f32 %v4528_v33, %v2718_v63  ;;  %v2717_v47 = vadd.f32 %v2558_v41, %v2450_v18  ;;  %v2217_v33 = vadd.f32 %v2178_v54, %v6198_v42 }
 0x1c5   : > { %v4475_v56 = vpop.f32.mrf.mxu1  ;;  %v2834_v29 = vpop.f32.mrf.mxu0 }
 0x1c6   : > { %v6333_v1 = vadd.f32 %v6319_v39, %v2984_v32  ;;  %v2983_v0 = vadd.f32 %v2824_v35, %v2717_v47  ;;  %v2720_v26 = vadd.f32 %v4475_v56, %v6212_v6  ;;  %v6404_v17 = vadd.f32 %v6296_v24, %v2217_v33 }
 0x1c7   : > { %v2568_v22 = vpop.f32.mrf.mxu1  ;;  %v4534_v11 = vpop.f32.mrf.mxu0 }
 0x1c8   : > { %v6351_v6 = vadd.f32 %v6319_v39, %v2983_v0  ;;  %v2986_v55 = vadd.f32 %v4531_v19, %v2720_v26  ;;  %v3124_v13 = vmul.f32 %v6333_v1, %v6333_v1  ;;  %v2719_v23 = vadd.f32 %v2568_v22, %v2452_v2 }
 0x1c9   : > { %v4478_v9 = vpop.f32.mrf.mxu1  ;;  %v2844_v38 = vpop.f32.mrf.mxu0  ;;  %v3055_v48 = vsel %vm442_vm1, %v6333_v1, 0.0 }
 0x1ca   : > { %v3123_v12 = vmul.f32 %v6351_v6, %v6351_v6  ;;  %v6370_v10 = vadd.f32 %v6319_v39, %v2986_v55  ;;  %v3054_v58 = vsel %vm442_vm1, %v6351_v6, 0.0  ;;  %v2985_v37 = vadd.f32 %v2834_v29, %v2719_v23 }
 0x1cb   : > { %v2722_v7 = vadd.f32 %v4478_v9, %v6219_v59  ;;  %v2578_v52 = vpop.f32.mrf.mxu1  ;;  %v4537_v18 = vpop.f32.mrf.mxu0  ;;  %v3156_v2 = vsel %vm442_vm1, %v3124_v13, 0.0  ;;  %v3056_v4 = vadd.f32 %v3055_v48, %v3054_v58  ;;  %v7079_v13 = vld [vmem:[#allocation41_spill] sm:$0xff] }
 0x1cc   : > { %v3155_v44 = vsel %vm442_vm1, %v3123_v12, 0.0  ;;  %v2721_v34 = vadd.f32 %v2578_v52, %v2454_v36  ;;  %v6387_v63 = vadd.f32 %v6319_v39, %v2985_v37  ;;  %v3126_v50 = vmul.f32 %v6370_v10, %v6370_v10 }
 0x1cd   : > { %v2988_v35 = vadd.f32 %v4534_v11, %v2722_v7  ;;  %v4481_v59 = vpop.f32.mrf.mxu1  ;;  %v2854_v54 = vpop.f32.mrf.mxu0  ;;  %v3157_v36 = vadd.f32 %v3156_v2, %v3155_v44  ;;  %v3059_v56 = vsel %vm442_vm1, %v6370_v10, 0.0 }
 0x1ce   : > { %v2987_v46 = vadd.f32 %v2844_v38, %v2721_v34  ;;  %v2724_v42 = vadd.f32 %v4481_v59, %v6226_v31  ;;  %v3057_v49 = vsel %vm442_vm1, %v6387_v63, 0.0  ;;  %v3125_v41 = vmul.f32 %v6387_v63, %v6387_v63  ;;  %v7080_v59 = vld [vmem:[#allocation42_spill] sm:$0xff] }
 0x1cf   : > { %v6397_v25 = vadd.f32 %v6319_v39, %v2988_v35  ;;  %v2588_v32 = vpop.f32.mrf.mxu1  ;;  %v3058_v47 = vadd.f32 %v3057_v49, %v3056_v4  ;;  %v4540_v31 = vpop.f32.mrf.mxu0  ;;  %v3160_v24 = vsel %vm442_vm1, %v3126_v50, 0.0 }
 0x1d0   : > { %v6400_v19 = vadd.f32 %v6319_v39, %v2987_v46  ;;  %v2990_v40 = vadd.f32 %v4537_v18, %v2724_v42  ;;  %v2723_v21 = vadd.f32 %v2588_v32, %v6322_v51  ;;  %v3158_v5 = vsel %vm442_vm1, %v3125_v41, 0.0 }
 0x1d1   : > { %v3128_v0 = vmul.f32 %v6397_v25, %v6397_v25  ;;  %v4484_v26 = vpop.f32.mrf.mxu1  ;;  %v3159_v29 = vadd.f32 %v3158_v5, %v3157_v36  ;;  %v3060_v8 = vadd.f32 %v3059_v56, %v3058_v47  ;;  %v2864_v15 = vpop.f32.mrf.mxu0  ;;  %v3063_v52 = vsel %vm442_vm1, %v6397_v25, 0.0 }
 0x1d2   : > { %v3061_v22 = vsel %vm442_vm1, %v6400_v19, 0.0  ;;  %v3127_v51 = vmul.f32 %v6400_v19, %v6400_v19  ;;  %v6417_v55 = vadd.f32 %v6319_v39, %v2990_v40  ;;  %v2989_v11 = vadd.f32 %v2854_v54, %v2723_v21 }
 0x1d3   : > { %v2726_v23 = vadd.f32 %v4484_v26, %v7079_v13  ;;  %v2598_v9 = vpop.f32.mrf.mxu1  ;;  %v3062_v12 = vadd.f32 %v3061_v22, %v3060_v8  ;;  %v3161_v38 = vadd.f32 %v3160_v24, %v3159_v29  ;;  %v4543_v7 = vpop.f32.mrf.mxu0  ;;  %v3164_v33 = vsel %vm442_vm1, %v3128_v0, 0.0  ;;  %v7081_v13 = vld [vmem:[#allocation43_spill] sm:$0xff] }
 0x1d4   : > { %v3162_v58 = vsel %vm442_vm1, %v3127_v51, 0.0  ;;  %v2725_v37 = vadd.f32 %v2598_v9, %v6326_v62  ;;  %v6426_v44 = vadd.f32 %v6319_v39, %v2989_v11  ;;  %v3130_v62 = vmul.f32 %v6417_v55, %v6417_v55 }
 0x1d5   : > { %v2992_v34 = vadd.f32 %v4540_v31, %v2726_v23  ;;  %v4487_v18 = vpop.f32.mrf.mxu1  ;;  %v3163_v48 = vadd.f32 %v3162_v58, %v3161_v38  ;;  %v3064_v2 = vadd.f32 %v3063_v52, %v3062_v12  ;;  %v2874_v50 = vpop.f32.mrf.mxu0  ;;  %v3067_v21 = vsel %vm442_vm1, %v6417_v55, 0.0 }
 0x1d6   : > { %v2991_v35 = vadd.f32 %v2864_v15, %v2725_v37  ;;  %v2728_v4 = vadd.f32 %v4487_v18, %v7080_v59  ;;  %v3065_v46 = vsel %vm442_vm1, %v6426_v44, 0.0  ;;  %v3129_v42 = vmul.f32 %v6426_v44, %v6426_v44  ;;  %v7082_v59 = vld [vmem:[#allocation44_spill] sm:$0xff] }
 0x1d7   : > { %v6436_v54 = vadd.f32 %v6319_v39, %v2992_v34  ;;  %v2608_v36 = vpop.f32.mrf.mxu1  ;;  %v3066_v49 = vadd.f32 %v3065_v46, %v3064_v2  ;;  %v3165_v41 = vadd.f32 %v3164_v33, %v3163_v48  ;;  %v4546_v40 = vpop.f32.mrf.mxu0  ;;  %v3168_v15 = vsel %vm442_vm1, %v3130_v62, 0.0 }
 0x1d8   : > { %v6439_v32 = vadd.f32 %v6319_v39, %v2991_v35  ;;  %v2994_v47 = vadd.f32 %v4543_v7, %v2728_v4  ;;  %v3166_v31 = vsel %vm442_vm1, %v3129_v42, 0.0  ;;  %v2727_v5 = vadd.f32 %v2608_v36, %v6337_v16 }
 0x1d9   : > { %v3132_v56 = vmul.f32 %v6436_v54, %v6436_v54  ;;  %v4490_v0 = vpop.f32.mrf.mxu1  ;;  %v3167_v26 = vadd.f32 %v3166_v31, %v3165_v41  ;;  %v3068_v29 = vadd.f32 %v3067_v21, %v3066_v49  ;;  %v2884_v51 = vpop.f32.mrf.mxu0  ;;  %v3071_v7 = vsel %vm442_vm1, %v6436_v54, 0.0 }
 0x1da   : > { %v3069_v8 = vsel %vm442_vm1, %v6439_v32, 0.0  ;;  %v3131_v22 = vmul.f32 %v6439_v32, %v6439_v32  ;;  %v6453_v24 = vadd.f32 %v6319_v39, %v2994_v47  ;;  %v2993_v11 = vadd.f32 %v2874_v50, %v2727_v5 }
 0x1db   : > { %v2730_v23 = vadd.f32 %v4490_v0, %v7081_v13  ;;  %v2618_v9 = vpop.f32.mrf.mxu1  ;;  %v3070_v16 = vadd.f32 %v3069_v8, %v3068_v29  ;;  %v3169_v12 = vadd.f32 %v3168_v15, %v3167_v26  ;;  %v4549_v37 = vpop.f32.mrf.mxu0  ;;  %v3172_v52 = vsel %vm442_vm1, %v3132_v56, 0.0 }
 0x1dc   : > { %v3170_v38 = vsel %vm442_vm1, %v3131_v22, 0.0  ;;  %v2729_v58 = vadd.f32 %v2618_v9, %v6340_v14  ;;  %v6462_v33 = vadd.f32 %v6319_v39, %v2993_v11  ;;  %v3134_v14 = vmul.f32 %v6453_v24, %v6453_v24  ;;  %v7083_v9 = vld [vmem:[#allocation45_spill] sm:$0xff] }
 0x1dd   : > { %v2996_v34 = vadd.f32 %v4546_v40, %v2730_v23  ;;  %v4493_v18 = vpop.f32.mrf.mxu1  ;;  %v3171_v48 = vadd.f32 %v3170_v38, %v3169_v12  ;;  %v3072_v2 = vadd.f32 %v3071_v7, %v3070_v16  ;;  %v2894_v50 = vpop.f32.mrf.mxu0  ;;  %v3075_v31 = vsel %vm442_vm1, %v6453_v24, 0.0 }
 0x1de   : > { %v2995_v35 = vadd.f32 %v2884_v51, %v2729_v58  ;;  %v2732_v4 = vadd.f32 %v4493_v18, %v7082_v59  ;;  %v3073_v62 = vsel %vm442_vm1, %v6462_v33, 0.0  ;;  %v3133_v46 = vmul.f32 %v6462_v33, %v6462_v33 }
 0x1df   : > { %v6472_v42 = vadd.f32 %v6319_v39, %v2996_v34  ;;  %v2628_v36 = vpop.f32.mrf.mxu1  ;;  %v3074_v49 = vadd.f32 %v3073_v62, %v3072_v2  ;;  %v3173_v41 = vadd.f32 %v3172_v52, %v3171_v48  ;;  %v4552_v21 = vpop.f32.mrf.mxu0  ;;  %v3176_v11 = vsel %vm442_vm1, %v3134_v14, 0.0 }
 0x1e0   : > { %v6475_v47 = vadd.f32 %v6319_v39, %v2995_v35  ;;  %v2998_v40 = vadd.f32 %v4549_v37, %v2732_v4  ;;  %v3174_v56 = vsel %vm442_vm1, %v3133_v46, 0.0  ;;  %v2731_v0 = vadd.f32 %v2628_v36, %v6343_v43 }
 0x1e1   : > { %v3136_v5 = vmul.f32 %v6472_v42, %v6472_v42  ;;  %v4496_v26 = vpop.f32.mrf.mxu1  ;;  %v3175_v29 = vadd.f32 %v3174_v56, %v3173_v41  ;;  %v3076_v8 = vadd.f32 %v3075_v31, %v3074_v49  ;;  %v2904_v15 = vpop.f32.mrf.mxu0  ;;  %v3079_v52 = vsel %vm442_vm1, %v6472_v42, 0.0 }
 0x1e2   : > { %v3077_v22 = vsel %vm442_vm1, %v6475_v47, 0.0  ;;  %v3135_v51 = vmul.f32 %v6475_v47, %v6475_v47  ;;  %v6489_v13 = vadd.f32 %v6319_v39, %v2998_v40  ;;  %v2997_v23 = vadd.f32 %v2894_v50, %v2731_v0  ;;  %v7084_v50 = vld [vmem:[#allocation46_spill] sm:$0xff] }
 0x1e3   : > { %v2734_v16 = vadd.f32 %v4496_v26, %v7083_v9  ;;  %v2638_v12 = vpop.f32.mrf.mxu1  ;;  %v3078_v43 = vadd.f32 %v3077_v22, %v3076_v8  ;;  %v3177_v38 = vadd.f32 %v3176_v11, %v3175_v29  ;;  %v4555_v7 = vpop.f32.mrf.mxu0  ;;  %v3180_v34 = vsel %vm442_vm1, %v3136_v5, 0.0 }
 0x1e4   : > { %v3178_v58 = vsel %vm442_vm1, %v3135_v51, 0.0  ;;  %v2733_v37 = vadd.f32 %v2638_v12, %v6347_v27  ;;  %v6498_v18 = vadd.f32 %v6319_v39, %v2997_v23  ;;  %v3138_v27 = vmul.f32 %v6489_v13, %v6489_v13 }
 0x1e5   : > { %v3000_v48 = vadd.f32 %v4552_v21, %v2734_v16  ;;  %v4499_v2 = vpop.f32.mrf.mxu1  ;;  %v3179_v35 = vadd.f32 %v3178_v58, %v3177_v38  ;;  %v3080_v59 = vadd.f32 %v3079_v52, %v3078_v43  ;;  %v2914_v62 = vpop.f32.mrf.mxu0  ;;  %v3083_v0 = vsel %vm442_vm1, %v6489_v13, 0.0  ;;  %v7085_v38 = vld [vmem:[#allocation47_spill] sm:$0xff] }
 0x1e6   : > { %v2999_v4 = vadd.f32 %v2904_v15, %v2733_v37  ;;  %v2736_v14 = vadd.f32 %v4499_v2, %v7084_v50  ;;  %v3081_v46 = vsel %vm442_vm1, %v6498_v18, 0.0  ;;  %v3137_v36 = vmul.f32 %v6498_v18, %v6498_v18 }
 0x1e7   : > { %v6508_v49 = vadd.f32 %v6319_v39, %v3000_v48  ;;  %v2648_v41 = vpop.f32.mrf.mxu1  ;;  %v3082_v40 = vadd.f32 %v3081_v46, %v3080_v59  ;;  %v3181_v21 = vadd.f32 %v3180_v34, %v3179_v35  ;;  %v4558_v5 = vpop.f32.mrf.mxu0  ;;  %v3184_v16 = vsel %vm442_vm1, %v3138_v27, 0.0  ;;  %v7086_v46 = vld [vmem:[#allocation19_spill] sm:$0xff] }
 0x1e8   : > { %v6511_v31 = vadd.f32 %v6319_v39, %v2999_v4  ;;  %v3002_v56 = vadd.f32 %v4555_v7, %v2736_v14  ;;  %v3182_v26 = vsel %vm442_vm1, %v3137_v36, 0.0  ;;  %v2735_v8 = vadd.f32 %v2648_v41, %v6354_v30 }
 0x1e9   : > { %v3140_v29 = vmul.f32 %v6508_v49, %v6508_v49  ;;  %v4502_v22 = vpop.f32.mrf.mxu1  ;;  %v3183_v51 = vadd.f32 %v3182_v26, %v3181_v21  ;;  %v3084_v15 = vadd.f32 %v3083_v0, %v3082_v40  ;;  %v2924_v9 = vpop.f32.mrf.mxu0  ;;  %v3087_v2 = vsel %vm442_vm1, %v6508_v49, 0.0 }
 0x1ea   : > { %v3085_v11 = vsel %vm442_vm1, %v6511_v31, 0.0  ;;  %v3139_v23 = vmul.f32 %v6511_v31, %v6511_v31  ;;  %v6525_v12 = vadd.f32 %v6319_v39, %v3002_v56  ;;  %v3001_v43 = vadd.f32 %v2914_v62, %v2735_v8 }
 0x1eb   : > { %v2738_v58 = vadd.f32 %v4502_v22, %v7085_v38  ;;  %v2658_v37 = vpop.f32.mrf.mxu1  ;;  %v3086_v30 = vadd.f32 %v3085_v11, %v3084_v15  ;;  %v3185_v7 = vadd.f32 %v3184_v16, %v3183_v51  ;;  %v4561_v48 = vpop.f32.mrf.mxu0  ;;  %v3188_v35 = vsel %vm442_vm1, %v3140_v29, 0.0 }
 0x1ec   : > { %v3186_v52 = vsel %vm442_vm1, %v3139_v23, 0.0  ;;  %v2737_v34 = vadd.f32 %v2658_v37, %v6357_v60  ;;  %v6534_v59 = vadd.f32 %v6319_v39, %v3001_v43  ;;  %v3142_v60 = vmul.f32 %v6525_v12, %v6525_v12 }
 0x1ed   : > { %v3004_v4 = vadd.f32 %v4558_v5, %v2738_v58  ;;  %v4505_v50 = vpop.f32.mrf.mxu1  ;;  %v3187_v14 = vadd.f32 %v3186_v52, %v3185_v7  ;;  %v3088_v62 = vadd.f32 %v3087_v2, %v3086_v30  ;;  %v2934_v41 = vpop.f32.mrf.mxu0  ;;  %v3091_v51 = vsel %vm442_vm1, %v6525_v12, 0.0 }
 0x1ee   : > { %v3003_v27 = vadd.f32 %v2924_v9, %v2737_v34  ;;  %v2740_v36 = vadd.f32 %v4505_v50, %v7086_v46  ;;  %v3089_v40 = vsel %vm442_vm1, %v6534_v59, 0.0  ;;  %v3141_v21 = vmul.f32 %v6534_v59, %v6534_v59  ;;  %v7087_v34 = vld [vmem:[#allocation24_spill] sm:$0xff] }
 0x1ef   : > { %v6544_v56 = vadd.f32 %v6319_v39, %v3004_v4  ;;  %v2668_v5 = vpop.f32.mrf.mxu1  ;;  %v3090_v0 = vadd.f32 %v3089_v40, %v3088_v62  ;;  %v3189_v26 = vadd.f32 %v3188_v35, %v3187_v14  ;;  %v4564_v22 = vpop.f32.mrf.mxu0  ;;  %v3192_v30 = vsel %vm442_vm1, %v3142_v60, 0.0 }
 0x1f0   : > { %v6547_v29 = vadd.f32 %v6319_v39, %v3003_v27  ;;  %v3006_v8 = vadd.f32 %v4561_v48, %v2740_v36  ;;  %v3190_v15 = vsel %vm442_vm1, %v3141_v21, 0.0  ;;  %v2739_v23 = vadd.f32 %v2668_v5, %v6362_v53 }
 0x1f1   : > { %v3144_v11 = vmul.f32 %v6544_v56, %v6544_v56  ;;  %v4508_v9 = vpop.f32.mrf.mxu1  ;;  %v3191_v16 = vadd.f32 %v3190_v15, %v3189_v26  ;;  %v3092_v43 = vadd.f32 %v3091_v51, %v3090_v0  ;;  %v2944_v37 = vpop.f32.mrf.mxu0  ;;  %v3095_v62 = vsel %vm442_vm1, %v6544_v56, 0.0 }
 0x1f2   : > { %v3093_v38 = vsel %vm442_vm1, %v6547_v29, 0.0  ;;  %v3143_v58 = vmul.f32 %v6547_v29, %v6547_v29  ;;  %v6561_v7 = vadd.f32 %v6319_v39, %v3006_v8  ;;  %v3005_v52 = vadd.f32 %v2934_v41, %v2739_v23 }
 0x1f3   : > { %v2742_v48 = vadd.f32 %v4508_v9, %v7087_v34  ;;  %v2678_v2 = vpop.f32.mrf.mxu1  ;;  %v3094_v53 = vadd.f32 %v3093_v38, %v3092_v43  ;;  %v3193_v35 = vadd.f32 %v3192_v30, %v3191_v16  ;;  %v4567_v14 = vpop.f32.mrf.mxu0  ;;  %v3196_v27 = vsel %vm442_vm1, %v3144_v11, 0.0 }
 0x1f4   : > { %v3194_v4 = vsel %vm442_vm1, %v3143_v58, 0.0  ;;  %v2741_v50 = vadd.f32 %v2678_v2, %v6365_v3  ;;  %v6570_v46 = vadd.f32 %v6319_v39, %v3005_v52  ;;  %v3146_v3 = vmul.f32 %v6561_v7, %v6561_v7 }
 0x1f5   : > { %v3008_v36 = vadd.f32 %v4564_v22, %v2742_v48  ;;  %v4511_v41 = vpop.f32.mrf.mxu1  ;;  %v3195_v60 = vadd.f32 %v3194_v4, %v3193_v35  ;;  %v3096_v40 = vadd.f32 %v3095_v62, %v3094_v53  ;;  %v2954_v0 = vpop.f32.mrf.mxu0  ;;  %v3099_v16 = vsel %vm442_vm1, %v6561_v7, 0.0 }
 0x1f6   : > { %v3007_v21 = vadd.f32 %v2944_v37, %v2741_v50  ;;  %v2744_v5 = vadd.f32 %v4511_v41, %v6284_v61  ;;  %v3097_v26 = vsel %vm442_vm1, %v6570_v46, 0.0  ;;  %v3145_v8 = vmul.f32 %v6570_v46, %v6570_v46 }
 0x1f7   : > { %v6580_v51 = vadd.f32 %v6319_v39, %v3008_v36  ;;  %v2688_v22 = vpop.f32.mrf.mxu1  ;;  %v3098_v15 = vadd.f32 %v3097_v26, %v3096_v40  ;;  %v3197_v11 = vadd.f32 %v3196_v27, %v3195_v60  ;;  %v4570_v9 = vpop.f32.mrf.mxu0  ;;  %v3200_v53 = vsel %vm442_vm1, %v3146_v3, 0.0 }
 0x1f8   : > { %v6583_v23 = vadd.f32 %v6319_v39, %v3007_v21  ;;  %v3010_v61 = vadd.f32 %v4567_v14, %v2744_v5  ;;  %v3198_v43 = vsel %vm442_vm1, %v3145_v8, 0.0  ;;  %v2743_v58 = vadd.f32 %v2688_v22, %v6373_v20 }
 0x1f9   : > { %v3148_v38 = vmul.f32 %v6580_v51, %v6580_v51  ;;  %v4514_v37 = vpop.f32.mrf.mxu1  ;;  %v3199_v30 = vadd.f32 %v3198_v43, %v3197_v11  ;;  %v3100_v52 = vadd.f32 %v3099_v16, %v3098_v15  ;;  %v2964_v2 = vpop.f32.mrf.mxu0  ;;  %v3103_v41 = vsel %vm442_vm1, %v6580_v51, 0.0 }
 0x1fa   : > { %v3101_v34 = vsel %vm442_vm1, %v6583_v23, 0.0  ;;  %v3147_v48 = vmul.f32 %v6583_v23, %v6583_v23  ;;  %v6597_v35 = vadd.f32 %v6319_v39, %v3010_v61  ;;  %v3009_v4 = vadd.f32 %v2954_v0, %v2743_v58 }
 0x1fb   : > { %v2746_v50 = vadd.f32 %v4514_v37, %v6289_v57  ;;  %v2698_v14 = vpop.f32.mrf.mxu1  ;;  %v3102_v20 = vadd.f32 %v3101_v34, %v3100_v52  ;;  %v3201_v62 = vadd.f32 %v3200_v53, %v3199_v30  ;;  %v3204_v60 = vsel %vm442_vm1, %v3148_v38, 0.0  ;;  %v4573_v8 = vpop.f32.mrf.mxu0 }
 0x1fc   : > { %v3202_v27 = vsel %vm442_vm1, %v3147_v48, 0.0  ;;  %v2745_v36 = vadd.f32 %v2698_v14, %v6379_v45  ;;  %v6606_v40 = vadd.f32 %v6319_v39, %v3009_v4  ;;  %v3150_v22 = vmul.f32 %v6597_v35, %v6597_v35 }
 0x1fd   : > { %v3012_v21 = vadd.f32 %v4570_v9, %v2746_v50  ;;  %v4517_v5 = vpop.f32.mrf.mxu1  ;;  %v3203_v0 = vadd.f32 %v3202_v27, %v3201_v62  ;;  %v3104_v3 = vadd.f32 %v3103_v41, %v3102_v20  ;;  %v3107_v38 = vsel %vm442_vm1, %v6597_v35, 0.0 }
 0x1fe   : > { %v3011_v57 = vadd.f32 %v2964_v2, %v2745_v36  ;;  %v2748_v26 = vadd.f32 %v4517_v5, %v6302_v28  ;;  %v3105_v45 = vsel %vm442_vm1, %v6606_v40, 0.0  ;;  %v3149_v15 = vmul.f32 %v6606_v40, %v6606_v40  ;;  %v2974_v2 = vpop.f32.mrf.mxu0 }
 0x1ff   : > { %v6616_v11 = vadd.f32 %v6319_v39, %v3012_v21  ;;  %v2708_v61 = vpop.f32.mrf.mxu1  ;;  %v3106_v9 = vadd.f32 %v3105_v45, %v3104_v3  ;;  %v3205_v16 = vadd.f32 %v3204_v60, %v3203_v0  ;;  %v3208_v53 = vsel %vm442_vm1, %v3150_v22, 0.0 }
 0x200   : > { %v6619_v43 = vadd.f32 %v6319_v39, %v3011_v57  ;;  %v3014_v28 = vadd.f32 %v4573_v8, %v2748_v26  ;;  %v3206_v58 = vsel %vm442_vm1, %v3149_v15, 0.0  ;;  %v2747_v37 = vadd.f32 %v2708_v61, %v6404_v17 }
 0x201   : > { %v3207_v30 = vadd.f32 %v3206_v58, %v3205_v16  ;;  %v3108_v52 = vadd.f32 %v3107_v38, %v3106_v9  ;;  %v3152_v4 = vmul.f32 %v6616_v11, %v6616_v11  ;;  %v3111_v27 = vsel %vm442_vm1, %v6616_v11, 0.0 }
 0x202   : > { %v3109_v34 = vsel %vm442_vm1, %v6619_v43, 0.0  ;;  %v3151_v48 = vmul.f32 %v6619_v43, %v6619_v43  ;;  %v6633_v50 = vadd.f32 %v6319_v39, %v3014_v28  ;;  %v3013_v14 = vadd.f32 %v2974_v2, %v2747_v37 }
 0x203   : > { %v3110_v20 = vadd.f32 %v3109_v34, %v3108_v52  ;;  %v3209_v17 = vadd.f32 %v3208_v53, %v3207_v30  ;;  %v3212_v21 = vsel %vm442_vm1, %v3152_v4, 0.0  ;;  %v3224_v16 = vlaneseq }
 0x204   : > { %v3210_v62 = vsel %vm442_vm1, %v3151_v48, 0.0  ;;  %v6639_v36 = vadd.f32 %v6319_v39, %v3013_v14  ;;  %v3154_v5 = vmul.f32 %v6633_v50, %v6633_v50  ;;  %v3115_v8 = vsel %vm442_vm1, %v6633_v50, 0.0 }
 0x205   : > { %v3211_v41 = vadd.f32 %v3210_v62, %v3209_v17  ;;  %v3112_v60 = vadd.f32 %v3111_v27, %v3110_v20  ;;  %v3225_v30 = vand.u32 127, %v3224_v16 }
 0x206   : > { %v3113_v0 = vsel %vm442_vm1, %v6639_v36, 0.0  ;;  %v3153_v3 = vmul.f32 %v6639_v36, %v6639_v36  ;;  %v3216_v15 = vsel %vm442_vm1, %v3154_v5, 0.0 }
 0x207   : > { %v3114_v57 = vadd.f32 %v3113_v0, %v3112_v60  ;;  %v3213_v26 = vadd.f32 %v3212_v21, %v3211_v41  ;;  %vm3226_vm3 = vcmp.lt.s32.totalorder %v3225_v30, 16 }
 0x208   : > { %v3214_v39 = vsel %vm442_vm1, %v3153_v3, 0.0 }
 0x209   : > { %v3215_v22 = vadd.f32 %v3214_v39, %v3213_v26  ;;  %v3116_v45 = vadd.f32 %v3115_v8, %v3114_v57 }
 0x20b   : > { %v3117_v61 = vrot.slane %v3116_v45, 4  ;;  %v3217_v9 = vadd.f32 %v3216_v15, %v3215_v22 }
 0x20d   : > { %v3118_v28 = vadd.f32 %v3117_v61, %v3116_v45  ;;  %v3218_v38 = vrot.slane %v3217_v9, 4 }
 0x20f   : > { %v3119_v58 = vrot.slane %v3118_v28, 2  ;;  %v3219_v37 = vadd.f32 %v3218_v38, %v3217_v9 }
 0x211   : > { %v3120_v52 = vadd.f32 %v3119_v58, %v3118_v28  ;;  %v3220_v34 = vrot.slane %v3219_v37, 2 }
 0x213   : > { %v3121_v48 = vrot.slane %v3120_v52, 1  ;;  %v3221_v2 = vadd.f32 %v3220_v34, %v3219_v37  ;;  %v3264_v37 = vshrl.u32 %v3224_v16, 7  ;;  %v3258_v34 = vld [vmem:[%s6855_s3] sm:$0x1] }
 0x215   : > { %v3122_v53 = vadd.f32 %v3121_v48, %v3120_v52  ;;  %v3222_v4 = vrot.slane %v3221_v2, 1 }
 0x217   : > { %v3227_v14 = vsel %vm3226_vm3, %v3122_v53, 0.0  ;;  %v3223_v20 = vadd.f32 %v3222_v4, %v3221_v2  ;;  %v3235_v41 = vsel %vm442_vm1, %v3122_v53, 0.0  ;;  %v3265_v2 = vsub.s32 0, %v3264_v37 }
 0x218   : > { %v3228_v17 = vsel %vm442_vm1, %v3227_v14, 0.0 }
 0x219   : > { %3229 = vadd.xlane.f32.xlu0 %v3228_v17  ;;  %v3231_v62 = vsel %vm3226_vm3, %v3223_v20, 0.0  ;;  %v3238_v60 = vsel %vm442_vm1, %v3223_v20, 0.0  ;;  %v3260_v20 = vld [vmem:[%s6856_s4] sm:$0x1] }
 0x21a   : > { %v3232_v27 = vsel %vm442_vm1, %v3231_v62, 0.0 }
 0x21b   : > { %3233 = vadd.xlane.f32.xlu1 %v3232_v27 }
 0x21d   : > { %3236 = vadd.xlane.f32.xlu0 %v3235_v41 }
 0x21f   : > { %3239 = vadd.xlane.f32.xlu1 %v3238_v60 }
 0x2a2   : > { %v3230_v21 = vpop.xlane.xlu0 %3229 }
 0x2a3   : > { %v3244_v5 = vmul.f32 0.00024414063, %v3230_v21 }
 0x2a4   : > { %v3234_v0 = vpop.xlane.xlu1 %3233 }
 0x2a5   : > { %v3247_v3 = vmul.f32 %v3244_v5, %v3244_v5  ;;  %v3246_v57 = vmul.f32 0.00024414063, %v3234_v0 }
 0x2a6   : > { %v3237_v26 = vpop.xlane.xlu0 %3236 }
 0x2a7   : > { %v3241_v8 = vsub.f32 %v3237_v26, %v3230_v21  ;;  %v3248_v39 = vsub.f32 %v3246_v57, %v3247_v3 }
 0x2a8   : > { %v3240_v22 = vpop.xlane.xlu1 %3239 }
 0x2a9   : > { %v3245_v45 = vmul.f32 0.00024414063, %v3241_v8  ;;  %v3242_v15 = vsub.f32 %v3240_v22, %v3234_v0  ;;  %v3252_v28 = vadd.f32 1e-05, %v3248_v39 }
 0x2ab   : > { %v3250_v61 = vmul.f32 %v3245_v45, %v3245_v45  ;;  %v3249_v9 = vmul.f32 0.00024414063, %v3242_v15  ;;  %4624 = vrsqrt.f32 %v3252_v28  ;;  %v3256_v14 = vsel %vm3226_vm3, %v3244_v5, %v3245_v45 }
 0x2ad   : > { %v3251_v38 = vsub.f32 %v3249_v9, %v3250_v61 }
 0x2af   : > { %v3254_v58 = vadd.f32 1e-05, %v3251_v38 }
 0x2b1   : > { %4626 = vrsqrt.f32 %v3254_v58 }
 0x2b8   : > { %v4625_v52 = vpop.eup %4624 }
 0x2be   : > { %v4627_v48 = vpop.eup %4626 }
 0x2bf   : > { %v3257_v53 = vsel %vm3226_vm3, %v4625_v52, %v4627_v48 }
 0x2c0   : > { %v3259_v4 = vmul.f32 %v3258_v34, %v3257_v53 }
 0x2c2   : > { %v3261_v17 = vmul.f32 %v3259_v4, %v3256_v14  ;;  %v3266_v62 = vrot.slane %v3259_v4, %v3265_v2 }
 0x2c4   : > { %v3262_v27 = vsub.f32 %v3260_v20, %v3261_v17  ;;  %v3267_v16 = vmul.f32 %v3266_v62, %v6351_v6  ;;  %v3268_v41 = vmul.f32 %v3266_v62, %v6333_v1  ;;  %v3269_v60 = vmul.f32 %v3266_v62, %v6387_v63 }
 0x2c5   : > { %v3270_v21 = vmul.f32 %v3266_v62, %v6370_v10  ;;  %v3271_v30 = vmul.f32 %v3266_v62, %v6400_v19  ;;  %v3272_v5 = vmul.f32 %v3266_v62, %v6397_v25  ;;  %v3273_v0 = vmul.f32 %v3266_v62, %v6426_v44 }
 0x2c6   : > { %v6674_v3 = vrot.slane %v3262_v27, %v3265_v2  ;;  %v3274_v57 = vmul.f32 %v3266_v62, %v6417_v55  ;;  %v3275_v6 = vmul.f32 %v3266_v62, %v6439_v32  ;;  %v3276_v26 = vmul.f32 %v3266_v62, %v6436_v54 }
 0x2c7   : > { %v3277_v1 = vmul.f32 %v3266_v62, %v6462_v33  ;;  %v3278_v63 = vmul.f32 %v3266_v62, %v6453_v24  ;;  %v3279_v10 = vmul.f32 %v3266_v62, %v6475_v47  ;;  %v3280_v19 = vmul.f32 %v3266_v62, %v6472_v42 }
 0x2c8   : > { %v3281_v25 = vmul.f32 %v3266_v62, %v6498_v18  ;;  %v3282_v44 = vmul.f32 %v3266_v62, %v6489_v13  ;;  %v3283_v55 = vmul.f32 %v3266_v62, %v6511_v31  ;;  %v3284_v32 = vmul.f32 %v3266_v62, %v6508_v49 }
 0x2c9   : > { %v3285_v54 = vmul.f32 %v3266_v62, %v6534_v59  ;;  %v3286_v33 = vmul.f32 %v3266_v62, %v6525_v12  ;;  %v3287_v24 = vmul.f32 %v3266_v62, %v6547_v29  ;;  %v3288_v47 = vmul.f32 %v3266_v62, %v6544_v56 }
 0x2ca   : > { %v3289_v42 = vmul.f32 %v3266_v62, %v6570_v46  ;;  %v3290_v8 = vmul.f32 %v3266_v62, %v6561_v7  ;;  %v3291_v18 = vmul.f32 %v3266_v62, %v6583_v23  ;;  %v3292_v13 = vmul.f32 %v3266_v62, %v6580_v51 }
 0x2cb   : > { %v3293_v31 = vmul.f32 %v3266_v62, %v6606_v40  ;;  %v3294_v49 = vmul.f32 %v3266_v62, %v6597_v35  ;;  %v3295_v59 = vmul.f32 %v3266_v62, %v6619_v43  ;;  %v3296_v12 = vmul.f32 %v3266_v62, %v6616_v11 }
 0x2cc   : > { %v3297_v29 = vmul.f32 %v3266_v62, %v6639_v36  ;;  %v3298_v56 = vmul.f32 %v3266_v62, %v6633_v50  ;;  %v3305_v46 = vadd.f32 %v6674_v3, %v3267_v16  ;;  %v3306_v7 = vadd.f32 %v6674_v3, %v3268_v41 }
 0x2cd   : > { %v3307_v23 = vadd.f32 %v6674_v3, %v3269_v60  ;;  %v3308_v51 = vadd.f32 %v6674_v3, %v3270_v21  ;;  %v3309_v40 = vadd.f32 %v6674_v3, %v3271_v30  ;;  %v3310_v35 = vadd.f32 %v6674_v3, %v3272_v5 }
 0x2ce   : > { %v3311_v43 = vadd.f32 %v6674_v3, %v3273_v0  ;;  %v3312_v11 = vadd.f32 %v6674_v3, %v3274_v57  ;;  %v3313_v36 = vadd.f32 %v6674_v3, %v3275_v6  ;;  %v3314_v50 = vadd.f32 %v6674_v3, %v3276_v26  ;;  %3337 = vst.msk [vmem:[%s6713_s13] sm:$0xff] %vm442_vm1, %v3305_v46 }
 0x2cf   : > { %3338 = vst.msk [vmem:[%s6713_s13 + $0x8] sm:$0xff] %vm442_vm1, %v3306_v7  ;;  %v3315_v39 = vadd.f32 %v6674_v3, %v3277_v1  ;;  %v3316_v22 = vadd.f32 %v6674_v3, %v3278_v63  ;;  %v3317_v45 = vadd.f32 %v6674_v3, %v3279_v10  ;;  %v3318_v15 = vadd.f32 %v6674_v3, %v3280_v19 }
 0x2d0   : > { %3339 = vst.msk [vmem:[%s6713_s13 + $0x10] sm:$0xff] %vm442_vm1, %v3307_v23  ;;  %3340 = vst.msk [vmem:[%s6713_s13 + $0x18] sm:$0xff] %vm442_vm1, %v3308_v51  ;;  %v3319_v61 = vadd.f32 %v6674_v3, %v3281_v25  ;;  %v3320_v9 = vadd.f32 %v6674_v3, %v3282_v44  ;;  %v3321_v28 = vadd.f32 %v6674_v3, %v3283_v55 }
 0x2d1   : > { %3341 = vst.msk [vmem:[%s6713_s13 + $0x20] sm:$0xff] %vm442_vm1, %v3309_v40  ;;  %3342 = vst.msk [vmem:[%s6713_s13 + $0x28] sm:$0xff] %vm442_vm1, %v3310_v35  ;;  %v3322_v38 = vadd.f32 %v6674_v3, %v3284_v32  ;;  %v3323_v58 = vadd.f32 %v6674_v3, %v3285_v54  ;;  %v3324_v37 = vadd.f32 %v6674_v3, %v3286_v33 }
 0x2d2   : > { %3343 = vst.msk [vmem:[%s6713_s13 + $0x30] sm:$0xff] %vm442_vm1, %v3311_v43  ;;  %3344 = vst.msk [vmem:[%s6713_s13 + $0x38] sm:$0xff] %vm442_vm1, %v3312_v11  ;;  %v3325_v52 = vadd.f32 %v6674_v3, %v3287_v24  ;;  %v3326_v34 = vadd.f32 %v6674_v3, %v3288_v47  ;;  %v3327_v48 = vadd.f32 %v6674_v3, %v3289_v42 }
 0x2d3   : > { %3345 = vst.msk [vmem:[%s6713_s13 + $0x40] sm:$0xff] %vm442_vm1, %v3313_v36  ;;  %3346 = vst.msk [vmem:[%s6713_s13 + $0x48] sm:$0xff] %vm442_vm1, %v3314_v50  ;;  %v3328_v2 = vadd.f32 %v6674_v3, %v3290_v8  ;;  %v3329_v53 = vadd.f32 %v6674_v3, %v3291_v18  ;;  %v3330_v4 = vadd.f32 %v6674_v3, %v3292_v13 }
 0x2d4   : > { %3347 = vst.msk [vmem:[%s6713_s13 + $0x50] sm:$0xff] %vm442_vm1, %v3315_v39  ;;  %3348 = vst.msk [vmem:[%s6713_s13 + $0x58] sm:$0xff] %vm442_vm1, %v3316_v22  ;;  %v3331_v14 = vadd.f32 %v6674_v3, %v3293_v31  ;;  %v3332_v20 = vadd.f32 %v6674_v3, %v3294_v49  ;;  %v3333_v17 = vadd.f32 %v6674_v3, %v3295_v59 }
 0x2d5   : > { %3349 = vst.msk [vmem:[%s6713_s13 + $0x60] sm:$0xff] %vm442_vm1, %v3317_v45  ;;  %3350 = vst.msk [vmem:[%s6713_s13 + $0x68] sm:$0xff] %vm442_vm1, %v3318_v15  ;;  %v3334_v62 = vadd.f32 %v6674_v3, %v3296_v12  ;;  %v3335_v27 = vadd.f32 %v6674_v3, %v3297_v29  ;;  %v3336_v16 = vadd.f32 %v6674_v3, %v3298_v56 }
 0x2d6   : > { %3351 = vst.msk [vmem:[%s6713_s13 + $0x70] sm:$0xff] %vm442_vm1, %v3319_v61  ;;  %3352 = vst.msk [vmem:[%s6713_s13 + $0x78] sm:$0xff] %vm442_vm1, %v3320_v9 }
 0x2d7   : > { %3353 = vst.msk [vmem:[%s6713_s13 + $0x80] sm:$0xff] %vm442_vm1, %v3321_v28  ;;  %3354 = vst.msk [vmem:[%s6713_s13 + $0x88] sm:$0xff] %vm442_vm1, %v3322_v38 }
 0x2d8   : > { %3355 = vst.msk [vmem:[%s6713_s13 + $0x90] sm:$0xff] %vm442_vm1, %v3323_v58  ;;  %3356 = vst.msk [vmem:[%s6713_s13 + $0x98] sm:$0xff] %vm442_vm1, %v3324_v37 }
 0x2d9   : > { %3357 = vst.msk [vmem:[%s6713_s13 + $0xa0] sm:$0xff] %vm442_vm1, %v3325_v52  ;;  %3358 = vst.msk [vmem:[%s6713_s13 + $0xa8] sm:$0xff] %vm442_vm1, %v3326_v34 }
 0x2da   : > { %3359 = vst.msk [vmem:[%s6713_s13 + $0xb0] sm:$0xff] %vm442_vm1, %v3327_v48  ;;  %3360 = vst.msk [vmem:[%s6713_s13 + $0xb8] sm:$0xff] %vm442_vm1, %v3328_v2 }
 0x2db   : > { %3361 = vst.msk [vmem:[%s6713_s13 + $0xc0] sm:$0xff] %vm442_vm1, %v3329_v53  ;;  %3362 = vst.msk [vmem:[%s6713_s13 + $0xc8] sm:$0xff] %vm442_vm1, %v3330_v4 }
 0x2dc   : > { %3363 = vst.msk [vmem:[%s6713_s13 + $0xd0] sm:$0xff] %vm442_vm1, %v3331_v14  ;;  %3364 = vst.msk [vmem:[%s6713_s13 + $0xd8] sm:$0xff] %vm442_vm1, %v3332_v20 }
 0x2dd   : > { %3365 = vst.msk [vmem:[%s6713_s13 + $0xe0] sm:$0xff] %vm442_vm1, %v3333_v17  ;;  %3366 = vst.msk [vmem:[%s6713_s13 + $0xe8] sm:$0xff] %vm442_vm1, %v3334_v62 }
 0x2de   : > { %3367 = vst.msk [vmem:[%s6713_s13 + $0xf0] sm:$0xff] %vm442_vm1, %v3335_v27  ;;  %3368 = vst.msk [vmem:[%s6713_s13 + $0xf8] sm:$0xff] %vm442_vm1, %v3336_v16 }
 0x2df   : > { %4641 = shalt.err (!%p4638_p3)
}
 0x2e0   : > { %s4642_s7 = scalar_lea.hbm %s6784_s23, 4096  ;;  %s4646_s10 = scalar_lea.hbm %s6857_s5, 8192 }
 0x2e1   : > { %p4643_p4 = scmp.ne.s32.totalorder %s6784_s23, %s4642_s7  ;;  %p4647_p9 = scmp.lt.s32.totalorder %s6784_s23, %s6857_s5 }
 0x2e2   : > { %p4648_p10 = scmp.lt.s32.totalorder %s4646_s10, %s4642_s7 }
 0x2e3   : > { %p4644_p7 = pnand %p4643_p4, %p4761_p5 }
 0x2e4   : > { %p4649_p11 = por %p4648_p10, %p4647_p9 }
 0x2e5   : > { %p4645_p8 = pneg %p4644_p7 }
 0x2e7   : > { %p4650_p12 = pnand %p4649_p11, %p4645_p8 }
 0x2e9   : > { %4653 = shalt.err (!%p4650_p12)
}
 0x2ea   : > { %s4691_s13 = smov 128   ;;  %s4692_s14 = smov 8  }
 0x2eb   : > { %4583 = dma.vmem_to_hbm [thread:$0]  (%p4761_p5), %s6786_s15, 4096, %s6784_s23, %s6812_s25, %s4691_s13, %s4691_s13, %s4692_s14  }
 0x2ec PF: > { %p4589_p13 = scmp.ge.s32.totalorder %s4688_s21, 2  ;;  %s3398_s22 = sand.u32 1, %s4676_s18  }
 0x2ed   : > { %s3399_s16 = scalar_lea.sflag [#allocation3], %s3398_s22 }
 0x2ee   : > { %p4586_p0 = pnand %p4589_p13, %p4765_p6 }
 0x2f0   : > { %p4587_p1 = pneg %p4586_p0 }
 0x2f2   : > { %4671 = dma.done.wait (%p4587_p1), %s3399_s16, 4096  }
 0x2f3   : > { %4673 = vsyncadd (%p4587_p1), %s3399_s16, 4294963200  ;;  %p15_p2 = scmp.ge.s32.totalorder %s4748_s24, 4   ;;  %s7088_s18 = smov %s4680_s19 }
 0x2f4   : > { %s7089_s19 = smov %s4684_s20  ;;  %s7090_s20 = smov %s4759_s27 }
 0x2f5   : > { %s7091_s21 = smov %s4748_s24  ;;  %17 = sbr.rel (!%p15_p2) target bundleno = 3 (0x3), region = 75 }
 0x2fa   :  { %3404 = vsyncpa [#allocation3], 1 }
 0x2fb   :  { %3406 = vsyncpa [#allocation3 + $0x1], 1 }

</bundles_post_ra>
